<compile_context>
chip_gen: v5e
topology: v5e:2x2
jax: 0.10.0
libtpu: 0.0.40
codegen_flags: <defaults>
</compile_context>

<pallas_src>
import numpy as np
import jax
import jax.numpy as jnp
from jax.experimental import pallas as pl
from jax.experimental.pallas import tpu as pltpu

# ---------------- configuration (small, consistent with the module) ----------------
TOTAL_DIM = 12
INPUT_IDXS = (0, 1, 2, 3, 4, 5)          # len = 6
OUTPUT_IDXS = (6, 7, 8, 9)               # len = 4
EMBED_DIM = 8
NUM_HEADS = 2
NUM_OUTPUTS = 4
WINDOW = 8                                # must be even
MAX_LEN = 64
BATCH = 2
SEQ_LEN = 16


# ---------------------------------- Pallas kernel ----------------------------------
def fused_tanh_band_attn_kernel(x_ref, wq_ref, wk_ref, wv_ref, bq_ref, bk_ref, bv_ref,
                                attn_ref, out_ref):
    # x_ref  : (N, L, D)      raw input (index selection folded into zero-padded weights)
    # wq/wk  : (H, D, E)      folded (outer proj ∘ inner proj) weights, zero-padded rows
    # wv     : (H, D, O)      per-head value projection, zero-padded rows
    # bq/bk  : (H, L, E)      folded bias + positional-encoding contribution (per position)
    # bv     : (H, 1, O)      value bias
    # attn_ref : (N, H, W1, L)   band diagonals, lane dim = L (transposed in the wrapper)
    # out_ref  : (N, L, O)       final output (already head-summed)
    N, L, _ = x_ref.shape
    H = wq_ref.shape[0]
    W1 = attn_ref.shape[2]
    half = (W1 - 1) // 2

    # Band / diagonal-selector masks built in-register (no HBM->VMEM DMA, hoisted once).
    row = jax.lax.broadcasted_iota(jnp.int32, (L, L), 0)
    col = jax.lax.broadcasted_iota(jnp.int32, (L, L), 1)
    off = col - row
    within = jnp.abs(off) <= half                          # (L, L) bool
    sels = [off == (d - half) for d in range(W1)]          # W1 bool masks, hoisted

    for n in range(N):                                     # static unroll (N tiny)
        x_n = x_ref[n]                                     # (L, D)
        out_n = jnp.zeros(out_ref.shape[1:], jnp.float32)  # (L, O)
        for h in range(H):                                 # static unroll (H tiny)
            q = jnp.dot(x_n, wq_ref[h],
                        preferred_element_type=jnp.float32) + bq_ref[h]      # (L, E)
            k = jnp.dot(x_n, wk_ref[h],
                        preferred_element_type=jnp.float32) + bk_ref[h]      # (L, E)
            v = jnp.dot(x_n, wv_ref[h],
                        preferred_element_type=jnp.float32) + bv_ref[h]      # (L, O)

            # banded scores + tanh; zero_value = 0 => mask-then-tanh is exact (tanh(0)=0)
            s = jax.lax.dot_general(q, k, (((1,), (1,)), ((), ())),
                                    preferred_element_type=jnp.float32)      # (L, L)
            a = jnp.tanh(jnp.where(within, s, 0.0))                           # (L, L)

            # attention-weighted values, summed over heads (a == 0 off-band)
            out_n = out_n + jnp.dot(a, v, preferred_element_type=jnp.float32)

            # band-diagonal extraction: attn[n, h, d, i] = a[i, i + d - half] (0 if OOB)
            # per-diagonal select + lane-reduce: no (W1, L, L) broadcast, no spills
            for d in range(W1):
                attn_ref[n, h, d, :] = jnp.sum(jnp.where(sels[d], a, 0.0), axis=-1)

        out_ref[n] = out_n


def fused_windowed_tanh_attention(x, wq, wk, wv, bq, bk, bv):
    N, L, D = x.shape
    H, _, E = wq.shape
    O = wv.shape[-1]
    W1 = WINDOW + 1
    return pl.pallas_call(
        fused_tanh_band_attn_kernel,
        out_shape=(jax.ShapeDtypeStruct((N, H, W1, L), jnp.float32),
                   jax.ShapeDtypeStruct((N, L, O), jnp.float32)),
        grid=(1,),                                   # collapsed: one grid step total
        in_specs=[
            pl.BlockSpec((N, L, D), lambda i: (0, 0, 0)),
            pl.BlockSpec((H, D, E), lambda i: (0, 0, 0)),
            pl.BlockSpec((H, D, E), lambda i: (0, 0, 0)),
            pl.BlockSpec((H, D, O), lambda i: (0, 0, 0)),
            pl.BlockSpec((H, L, E), lambda i: (0, 0, 0)),
            pl.BlockSpec((H, L, E), lambda i: (0, 0, 0)),
            pl.BlockSpec((H, 1, O), lambda i: (0, 0, 0)),
        ],
        out_specs=(
            pl.BlockSpec((N, H, W1, L), lambda i: (0, 0, 0, 0)),
            pl.BlockSpec((N, L, O), lambda i: (0, 0, 0)),
        ),
        compiler_params=pltpu.CompilerParams(dimension_semantics=("arbitrary",)),
    )(x, wq, wk, wv, bq, bk, bv)


# ------------------------------------ JAX glue --------------------------------------
def positional_encoding_table(max_len, d_model):
    # standard sinusoidal PositionalEncoding (dropout=0)
    position = np.arange(max_len, dtype=np.float32)[:, None]
    div_term = np.exp(np.arange(0, d_model, 2, dtype=np.float32)
                      * (-np.log(10000.0) / d_model))
    pe = np.zeros((max_len, d_model), np.float32)
    pe[:, 0::2] = np.sin(position * div_term)
    pe[:, 1::2] = np.cos(position * div_term)
    return jnp.asarray(pe)


def init_params(key):
    def lin(key, out_dim, in_dim, scale=0.1):
        kw, kb = jax.random.split(key)
        w = scale * jax.random.normal(kw, (out_dim, in_dim), jnp.float32)
        b = scale * jax.random.normal(kb, (out_dim,), jnp.float32)
        return w, b

    keys = jax.random.split(key, 5)
    p = {}
    p['Wq_o'], p['bq_o'] = lin(keys[0], NUM_HEADS * EMBED_DIM, len(INPUT_IDXS))
    p['Wk_o'], p['bk_o'] = lin(keys[1], NUM_HEADS * EMBED_DIM, len(INPUT_IDXS))
    p['Wv_o'], p['bv_o'] = lin(keys[2], NUM_HEADS * NUM_OUTPUTS, len(OUTPUT_IDXS))
    p['Wq_i'], p['bq_i'] = lin(keys[3], EMBED_DIM, EMBED_DIM)   # inner attn-layer proj_q
    p['Wk_i'], p['bk_i'] = lin(keys[4], EMBED_DIM, EMBED_DIM)   # inner attn-layer proj_k
    p['pe'] = positional_encoding_table(MAX_LEN, EMBED_DIM)
    return p


def prepare_kernel_params(params, L):
    # One-time (host-side) exact algebraic fold of:
    #   outer per-head projection + PE add + inner attn-layer projection
    # into a single per-head weight (zero-padded to TOTAL_DIM rows, folding the
    # input/output index selection) and a per-position bias:
    #   Wq_i @ (Wq_o_h @ x_in + bq_o_h + pe) + bq_i
    #     = x @ Wq_pad_h + (Wq_i @ bq_o_h + bq_i) + pe @ Wq_i^T
    # Valid ONLY because the inner projection is linear and applied after the PE add.
    H, E, O, D = NUM_HEADS, EMBED_DIM, NUM_OUTPUTS, TOTAL_DIM
    in_idx = np.asarray(INPUT_IDXS)
    out_idx = np.asarray(OUTPUT_IDXS)
    pe = np.asarray(params['pe'])[:L]                          # (L, E)

    def fold_qk(W_o, b_o, W_i, b_i):
        W_o = np.asarray(W_o).reshape(H, E, len(in_idx))       # (H, E, Din)
        b_o = np.asarray(b_o).reshape(H, E)                    # (H, E)
        W_i = np.asarray(W_i)                                  # (E, E)
        b_i = np.asarray(b_i)                                  # (E,)
        pe_c = pe @ W_i.T                                      # (L, E)
        W_pad = np.zeros((H, D, E), np.float32)
        B = np.zeros((H, L, E), np.float32)
        for h in range(H):
            Wc = W_i @ W_o[h]                                  # (E, Din)
            W_pad[h, in_idx, :] = Wc.T                         # place at input rows
            B[h] = (W_i @ b_o[h] + b_i)[None, :] + pe_c
        return jnp.asarray(W_pad), jnp.asarray(B)

    wq, bq = fold_qk(params['Wq_o'], params['bq_o'], params['Wq_i'], params['bq_i'])
    wk, bk = fold_qk(params['Wk_o'], params['bk_o'], params['Wk_i'], params['bk_i'])

    Wv_o = np.asarray(params['Wv_o']).reshape(H, O, len(out_idx))   # (H, O, Dout)
    bv_o = np.asarray(params['bv_o']).reshape(H, O)
    wv = np.zeros((H, D, O), np.float32)
    for h in range(H):
        wv[h, out_idx, :] = Wv_o[h].T                          # place at output rows
    bv = bv_o.reshape(H, 1, O).astype(np.float32)

    return dict(wq=wq, wk=wk, wv=jnp.asarray(wv), bq=bq, bk=bk, bv=jnp.asarray(bv))


def model_forward(x, kp):
    attn_nhdl, out = fused_windowed_tanh_attention(
        x, kp['wq'], kp['wk'], kp['wv'], kp['bq'], kp['bk'], kp['bv'])
    # layout plumbing only: (N, H, W+1, L) -> PyTorch (N, L, W+1, H)
    attn = jnp.transpose(attn_nhdl, (0, 3, 2, 1))
    return dict(attn_matrix=attn, output=out)


# ------------------------------ pure reference (un-folded path) ----------------------
def reference_forward(x, params):
    N, L, _ = x.shape
    H, E, O = NUM_HEADS, EMBED_DIM, NUM_OUTPUTS
    half = WINDOW // 2
    x_np = np.asarray(x)
    p = {k: np.asarray(v) for k, v in params.items()}
    x_in = x_np[:, :, list(INPUT_IDXS)]
    x_out = x_np[:, :, list(OUTPUT_IDXS)]

    q = x_in @ p['Wq_o'].T + p['bq_o']
    k = x_in @ p['Wk_o'].T + p['bk_o']
    v = x_out @ p['Wv_o'].T + p['bv_o']
    pe = p['pe'][:L]
    q = q.reshape(N, L, H, E) + pe[None, :, None, :]
    k = k.reshape(N, L, H, E) + pe[None, :, None, :]
    v = v.reshape(N, L, H, O)
    # inner attention-layer projections (structural, not folded)
    q = np.einsum('nlhe,fe->nlhf', q, p['Wq_i']) + p['bq_i']
    k = np.einsum('nlhe,fe->nlhf', k, p['Wk_i']) + p['bk_i']
    # full banded attention (torch's chunked path == this for pointwise tanh, zero_value=0)
    s = np.einsum('nihe,njhe->nijh', q, k)
    ii = np.arange(L)[:, None]
    jj = np.arange(L)[None, :]
    within = np.abs(ii - jj) <= half
    s = np.where(within[None, :, :, None], s, 0.0)
    a = np.tanh(s)
    out = np.einsum('nijh,njho->nio', a, v)
    attn = np.zeros((N, L, WINDOW + 1, H), np.float32)
    for i in range(L):
        for d in range(WINDOW + 1):
            j = i + d - half
            if 0 <= j < L:
                attn[:, i, d, :] = a[:, i, j, :]
    return attn.astype(np.float32), out.astype(np.float32)


# ------------------------------------- main -------------------------------------------
if __name__ == "__main__":
    key = jax.random.PRNGKey(0)
    kx, kp = jax.random.split(key)
    x = jax.random.normal(kx, (BATCH, SEQ_LEN, TOTAL_DIM), jnp.float32)
    params = init_params(kp)
    kernel_params = prepare_kernel_params(params, SEQ_LEN)   # one-time weight fold / pad

    fwd = jax.jit(model_forward)
    result = fwd(x, kernel_params)
    jax.block_until_ready(result)

    ref_attn, ref_out = reference_forward(x, params)
    np.testing.assert_allclose(np.asarray(result['attn_matrix']), ref_attn,
                               rtol=2e-4, atol=2e-5)
    np.testing.assert_allclose(np.asarray(result['output']), ref_out,
                               rtol=2e-4, atol=2e-5)
    print("KERNEL_OK")
</pallas_src>

<mosaic_0001>
module attributes {stable_mosaic.version = 11 : i64} {
  func.func @fused_tanh_band_attn_kernel(%arg0: i32, %arg1: memref<2x16x12xf32, #tpu.memory_space<vmem>>, %arg2: memref<2x12x8xf32, #tpu.memory_space<vmem>>, %arg3: memref<2x12x8xf32, #tpu.memory_space<vmem>>, %arg4: memref<2x12x4xf32, #tpu.memory_space<vmem>>, %arg5: memref<2x16x8xf32, #tpu.memory_space<vmem>>, %arg6: memref<2x16x8xf32, #tpu.memory_space<vmem>>, %arg7: memref<2x1x4xf32, #tpu.memory_space<vmem>>, %arg8: memref<2x2x9x16xf32, #tpu.memory_space<vmem>>, %arg9: memref<2x16x4xf32, #tpu.memory_space<vmem>>) attributes {dimension_semantics = [#tpu.dimension_semantics<arbitrary>], iteration_bounds = array<i64: 1>, scalar_prefetch = 0 : i64, scratch_operands = 0 : i64, tpu.core_type = #tpu.core_type<tc>, window_params = [{pipeline_mode = #tpu.pipeline_mode<synchronous>, transform_indices = @transform_0, window_bounds = array<i64: 2, 16, 12>}, {pipeline_mode = #tpu.pipeline_mode<synchronous>, transform_indices = @transform_1, window_bounds = array<i64: 2, 12, 8>}, {pipeline_mode = #tpu.pipeline_mode<synchronous>, transform_indices = @transform_2, window_bounds = array<i64: 2, 12, 8>}, {pipeline_mode = #tpu.pipeline_mode<synchronous>, transform_indices = @transform_3, window_bounds = array<i64: 2, 12, 4>}, {pipeline_mode = #tpu.pipeline_mode<synchronous>, transform_indices = @transform_4, window_bounds = array<i64: 2, 16, 8>}, {pipeline_mode = #tpu.pipeline_mode<synchronous>, transform_indices = @transform_5, window_bounds = array<i64: 2, 16, 8>}, {pipeline_mode = #tpu.pipeline_mode<synchronous>, transform_indices = @transform_6, window_bounds = array<i64: 2, 1, 4>}, {pipeline_mode = #tpu.pipeline_mode<synchronous>, transform_indices = @transform_7, window_bounds = array<i64: 2, 2, 9, 16>}, {pipeline_mode = #tpu.pipeline_mode<synchronous>, transform_indices = @transform_8, window_bounds = array<i64: 2, 16, 4>}]} {
    %0 = tpu.iota {dimensions = array<i32: 0>} : vector<16x16xi32>
    %1 = tpu.iota {dimensions = array<i32: 1>} : vector<16x16xi32>
    %2 = arith.subi %1, %0 : vector<16x16xi32>
    %3 = math.absi %2 : vector<16x16xi32>
    %c4_i32 = arith.constant 4 : i32
    %4 = vector.broadcast %c4_i32 : i32 to vector<16x16xi32>
    %5 = arith.cmpi sle, %3, %4 : vector<16x16xi32>
    %c-4_i32 = arith.constant -4 : i32
    %6 = vector.broadcast %c-4_i32 : i32 to vector<16x16xi32>
    %7 = arith.cmpi eq, %2, %6 : vector<16x16xi32>
    %c-3_i32 = arith.constant -3 : i32
    %8 = vector.broadcast %c-3_i32 : i32 to vector<16x16xi32>
    %9 = arith.cmpi eq, %2, %8 : vector<16x16xi32>
    %c-2_i32 = arith.constant -2 : i32
    %10 = vector.broadcast %c-2_i32 : i32 to vector<16x16xi32>
    %11 = arith.cmpi eq, %2, %10 : vector<16x16xi32>
    %c-1_i32 = arith.constant -1 : i32
    %12 = vector.broadcast %c-1_i32 : i32 to vector<16x16xi32>
    %13 = arith.cmpi eq, %2, %12 : vector<16x16xi32>
    %c0_i32 = arith.constant 0 : i32
    %14 = vector.broadcast %c0_i32 : i32 to vector<16x16xi32>
    %15 = arith.cmpi eq, %2, %14 : vector<16x16xi32>
    %c1_i32 = arith.constant 1 : i32
    %16 = vector.broadcast %c1_i32 : i32 to vector<16x16xi32>
    %17 = arith.cmpi eq, %2, %16 : vector<16x16xi32>
    %c2_i32 = arith.constant 2 : i32
    %18 = vector.broadcast %c2_i32 : i32 to vector<16x16xi32>
    %19 = arith.cmpi eq, %2, %18 : vector<16x16xi32>
    %c3_i32 = arith.constant 3 : i32
    %20 = vector.broadcast %c3_i32 : i32 to vector<16x16xi32>
    %21 = arith.cmpi eq, %2, %20 : vector<16x16xi32>
    %c4_i32_0 = arith.constant 4 : i32
    %22 = vector.broadcast %c4_i32_0 : i32 to vector<16x16xi32>
    %23 = arith.cmpi eq, %2, %22 : vector<16x16xi32>
    %c0 = arith.constant 0 : index
    %c0_1 = arith.constant 0 : index
    %c0_2 = arith.constant 0 : index
    %24 = vector.load %arg1[%c0, %c0_1, %c0_2] : memref<2x16x12xf32, #tpu.memory_space<vmem>>, vector<1x16x12xf32>
    %25 = vector.shape_cast %24 : vector<1x16x12xf32> to vector<16x12xf32>
    %cst = arith.constant 0.000000e+00 : f32
    %26 = vector.broadcast %cst : f32 to vector<16x4xf32>
    %c0_3 = arith.constant 0 : index
    %c0_4 = arith.constant 0 : index
    %c0_5 = arith.constant 0 : index
    %27 = vector.load %arg2[%c0_3, %c0_4, %c0_5] : memref<2x12x8xf32, #tpu.memory_space<vmem>>, vector<1x12x8xf32>
    %28 = vector.shape_cast %27 : vector<1x12x8xf32> to vector<12x8xf32>
    %cst_6 = arith.constant dense<0.000000e+00> : vector<16x8xf32>
    %29 = tpu.matmul %25, %28, %cst_6 {dimension_numbers = #tpu.dot_dimension_numbers<[1], [0], [0], [1], [0, 0, 1, 1], [], []>} : vector<16x12xf32>, vector<12x8xf32>, vector<16x8xf32> -> vector<16x8xf32>
    %c0_7 = arith.constant 0 : index
    %c0_8 = arith.constant 0 : index
    %c0_9 = arith.constant 0 : index
    %30 = vector.load %arg5[%c0_7, %c0_8, %c0_9] : memref<2x16x8xf32, #tpu.memory_space<vmem>>, vector<1x16x8xf32>
    %31 = vector.shape_cast %30 : vector<1x16x8xf32> to vector<16x8xf32>
    %32 = arith.addf %29, %31 : vector<16x8xf32>
    %c0_10 = arith.constant 0 : index
    %c0_11 = arith.constant 0 : index
    %c0_12 = arith.constant 0 : index
    %33 = vector.load %arg3[%c0_10, %c0_11, %c0_12] : memref<2x12x8xf32, #tpu.memory_space<vmem>>, vector<1x12x8xf32>
    %34 = vector.shape_cast %33 : vector<1x12x8xf32> to vector<12x8xf32>
    %cst_13 = arith.constant dense<0.000000e+00> : vector<16x8xf32>
    %35 = tpu.matmul %25, %34, %cst_13 {dimension_numbers = #tpu.dot_dimension_numbers<[1], [0], [0], [1], [0, 0, 1, 1], [], []>} : vector<16x12xf32>, vector<12x8xf32>, vector<16x8xf32> -> vector<16x8xf32>
    %c0_14 = arith.constant 0 : index
    %c0_15 = arith.constant 0 : index
    %c0_16 = arith.constant 0 : index
    %36 = vector.load %arg6[%c0_14, %c0_15, %c0_16] : memref<2x16x8xf32, #tpu.memory_space<vmem>>, vector<1x16x8xf32>
    %37 = vector.shape_cast %36 : vector<1x16x8xf32> to vector<16x8xf32>
    %38 = arith.addf %35, %37 : vector<16x8xf32>
    %c0_17 = arith.constant 0 : index
    %c0_18 = arith.constant 0 : index
    %c0_19 = arith.constant 0 : index
    %39 = vector.load %arg4[%c0_17, %c0_18, %c0_19] : memref<2x12x4xf32, #tpu.memory_space<vmem>>, vector<1x12x4xf32>
    %40 = vector.shape_cast %39 : vector<1x12x4xf32> to vector<12x4xf32>
    %cst_20 = arith.constant dense<0.000000e+00> : vector<16x4xf32>
    %41 = tpu.matmul %25, %40, %cst_20 {dimension_numbers = #tpu.dot_dimension_numbers<[1], [0], [0], [1], [0, 0, 1, 1], [], []>} : vector<16x12xf32>, vector<12x4xf32>, vector<16x4xf32> -> vector<16x4xf32>
    %c0_21 = arith.constant 0 : index
    %c0_22 = arith.constant 0 : index
    %c0_23 = arith.constant 0 : index
    %42 = vector.load %arg7[%c0_21, %c0_22, %c0_23] : memref<2x1x4xf32, #tpu.memory_space<vmem>>, vector<1x1x4xf32>
    %43 = vector.shape_cast %42 : vector<1x1x4xf32> to vector<1x4xf32>
    %44 = vector.broadcast %43 : vector<1x4xf32> to vector<16x4xf32>
    %45 = arith.addf %41, %44 : vector<16x4xf32>
    %cst_24 = arith.constant dense<0.000000e+00> : vector<16x16xf32>
    %46 = tpu.matmul %32, %38, %cst_24 {dimension_numbers = #tpu.dot_dimension_numbers<[1], [1], [0], [0], [0, 0, 1, 0], [], []>} : vector<16x8xf32>, vector<16x8xf32>, vector<16x16xf32> -> vector<16x16xf32>
    %cst_25 = arith.constant 0.000000e+00 : f32
    %47 = vector.broadcast %cst_25 : f32 to vector<16x16xf32>
    %48 = arith.select %5, %46, %47 : vector<16x16xi1>, vector<16x16xf32>
    %49 = math.tanh %48 : vector<16x16xf32>
    %cst_26 = arith.constant dense<0.000000e+00> : vector<16x4xf32>
    %50 = tpu.matmul %49, %45, %cst_26 {dimension_numbers = #tpu.dot_dimension_numbers<[1], [0], [0], [1], [0, 0, 1, 1], [], []>} : vector<16x16xf32>, vector<16x4xf32>, vector<16x4xf32> -> vector<16x4xf32>
    %51 = arith.addf %26, %50 : vector<16x4xf32>
    %cst_27 = arith.constant 0.000000e+00 : f32
    %52 = vector.broadcast %cst_27 : f32 to vector<16x16xf32>
    %53 = arith.select %7, %49, %52 : vector<16x16xi1>, vector<16x16xf32>
    %cst_28 = arith.constant dense<0.000000e+00> : vector<16xf32>
    %54 = vector.multi_reduction <add>, %53, %cst_28 [1] : vector<16x16xf32> to vector<16xf32>
    %c0_29 = arith.constant 0 : index
    %c0_30 = arith.constant 0 : index
    %c0_31 = arith.constant 0 : index
    %c0_32 = arith.constant 0 : index
    %55 = vector.load %arg8[%c0_29, %c0_30, %c0_31, %c0_32] : memref<2x2x9x16xf32, #tpu.memory_space<vmem>>, vector<1x1x1x16xf32>
    %56 = vector.shape_cast %55 : vector<1x1x1x16xf32> to vector<16xf32>
    %57 = vector.shape_cast %54 : vector<16xf32> to vector<1x1x1x16xf32>
    tpu.vector_store %arg8[%c0_29, %c0_30, %c0_31, %c0_32], %57 {strides = array<i32>} : memref<2x2x9x16xf32, #tpu.memory_space<vmem>>, vector<1x1x1x16xf32>,
    %cst_33 = arith.constant 0.000000e+00 : f32
    %58 = vector.broadcast %cst_33 : f32 to vector<16x16xf32>
    %59 = arith.select %9, %49, %58 : vector<16x16xi1>, vector<16x16xf32>
    %cst_34 = arith.constant dense<0.000000e+00> : vector<16xf32>
    %60 = vector.multi_reduction <add>, %59, %cst_34 [1] : vector<16x16xf32> to vector<16xf32>
    %c0_35 = arith.constant 0 : index
    %c0_36 = arith.constant 0 : index
    %c1 = arith.constant 1 : index
    %c0_37 = arith.constant 0 : index
    %61 = vector.load %arg8[%c0_35, %c0_36, %c1, %c0_37] : memref<2x2x9x16xf32, #tpu.memory_space<vmem>>, vector<1x1x1x16xf32>
    %62 = vector.shape_cast %61 : vector<1x1x1x16xf32> to vector<16xf32>
    %63 = vector.shape_cast %60 : vector<16xf32> to vector<1x1x1x16xf32>
    tpu.vector_store %arg8[%c0_35, %c0_36, %c1, %c0_37], %63 {strides = array<i32>} : memref<2x2x9x16xf32, #tpu.memory_space<vmem>>, vector<1x1x1x16xf32>,
    %cst_38 = arith.constant 0.000000e+00 : f32
    %64 = vector.broadcast %cst_38 : f32 to vector<16x16xf32>
    %65 = arith.select %11, %49, %64 : vector<16x16xi1>, vector<16x16xf32>
    %cst_39 = arith.constant dense<0.000000e+00> : vector<16xf32>
    %66 = vector.multi_reduction <add>, %65, %cst_39 [1] : vector<16x16xf32> to vector<16xf32>
    %c0_40 = arith.constant 0 : index
    %c0_41 = arith.constant 0 : index
    %c2 = arith.constant 2 : index
    %c0_42 = arith.constant 0 : index
    %67 = vector.load %arg8[%c0_40, %c0_41, %c2, %c0_42] : memref<2x2x9x16xf32, #tpu.memory_space<vmem>>, vector<1x1x1x16xf32>
    %68 = vector.shape_cast %67 : vector<1x1x1x16xf32> to vector<16xf32>
    %69 = vector.shape_cast %66 : vector<16xf32> to vector<1x1x1x16xf32>
    tpu.vector_store %arg8[%c0_40, %c0_41, %c2, %c0_42], %69 {strides = array<i32>} : memref<2x2x9x16xf32, #tpu.memory_space<vmem>>, vector<1x1x1x16xf32>,
    %cst_43 = arith.constant 0.000000e+00 : f32
    %70 = vector.broadcast %cst_43 : f32 to vector<16x16xf32>
    %71 = arith.select %13, %49, %70 : vector<16x16xi1>, vector<16x16xf32>
    %cst_44 = arith.constant dense<0.000000e+00> : vector<16xf32>
    %72 = vector.multi_reduction <add>, %71, %cst_44 [1] : vector<16x16xf32> to vector<16xf32>
    %c0_45 = arith.constant 0 : index
    %c0_46 = arith.constant 0 : index
    %c3 = arith.constant 3 : index
    %c0_47 = arith.constant 0 : index
    %73 = vector.load %arg8[%c0_45, %c0_46, %c3, %c0_47] : memref<2x2x9x16xf32, #tpu.memory_space<vmem>>, vector<1x1x1x16xf32>
    %74 = vector.shape_cast %73 : vector<1x1x1x16xf32> to vector<16xf32>
    %75 = vector.shape_cast %72 : vector<16xf32> to vector<1x1x1x16xf32>
    tpu.vector_store %arg8[%c0_45, %c0_46, %c3, %c0_47], %75 {strides = array<i32>} : memref<2x2x9x16xf32, #tpu.memory_space<vmem>>, vector<1x1x1x16xf32>,
    %cst_48 = arith.constant 0.000000e+00 : f32
    %76 = vector.broadcast %cst_48 : f32 to vector<16x16xf32>
    %77 = arith.select %15, %49, %76 : vector<16x16xi1>, vector<16x16xf32>
    %cst_49 = arith.constant dense<0.000000e+00> : vector<16xf32>
    %78 = vector.multi_reduction <add>, %77, %cst_49 [1] : vector<16x16xf32> to vector<16xf32>
    %c0_50 = arith.constant 0 : index
    %c0_51 = arith.constant 0 : index
    %c4 = arith.constant 4 : index
    %c0_52 = arith.constant 0 : index
    %79 = vector.load %arg8[%c0_50, %c0_51, %c4, %c0_52] : memref<2x2x9x16xf32, #tpu.memory_space<vmem>>, vector<1x1x1x16xf32>
    %80 = vector.shape_cast %79 : vector<1x1x1x16xf32> to vector<16xf32>
    %81 = vector.shape_cast %78 : vector<16xf32> to vector<1x1x1x16xf32>
    tpu.vector_store %arg8[%c0_50, %c0_51, %c4, %c0_52], %81 {strides = array<i32>} : memref<2x2x9x16xf32, #tpu.memory_space<vmem>>, vector<1x1x1x16xf32>,
    %cst_53 = arith.constant 0.000000e+00 : f32
    %82 = vector.broadcast %cst_53 : f32 to vector<16x16xf32>
    %83 = arith.select %17, %49, %82 : vector<16x16xi1>, vector<16x16xf32>
    %cst_54 = arith.constant dense<0.000000e+00> : vector<16xf32>
    %84 = vector.multi_reduction <add>, %83, %cst_54 [1] : vector<16x16xf32> to vector<16xf32>
    %c0_55 = arith.constant 0 : index
    %c0_56 = arith.constant 0 : index
    %c5 = arith.constant 5 : index
    %c0_57 = arith.constant 0 : index
    %85 = vector.load %arg8[%c0_55, %c0_56, %c5, %c0_57] : memref<2x2x9x16xf32, #tpu.memory_space<vmem>>, vector<1x1x1x16xf32>
    %86 = vector.shape_cast %85 : vector<1x1x1x16xf32> to vector<16xf32>
    %87 = vector.shape_cast %84 : vector<16xf32> to vector<1x1x1x16xf32>
    tpu.vector_store %arg8[%c0_55, %c0_56, %c5, %c0_57], %87 {strides = array<i32>} : memref<2x2x9x16xf32, #tpu.memory_space<vmem>>, vector<1x1x1x16xf32>,
    %cst_58 = arith.constant 0.000000e+00 : f32
    %88 = vector.broadcast %cst_58 : f32 to vector<16x16xf32>
    %89 = arith.select %19, %49, %88 : vector<16x16xi1>, vector<16x16xf32>
    %cst_59 = arith.constant dense<0.000000e+00> : vector<16xf32>
    %90 = vector.multi_reduction <add>, %89, %cst_59 [1] : vector<16x16xf32> to vector<16xf32>
    %c0_60 = arith.constant 0 : index
    %c0_61 = arith.constant 0 : index
    %c6 = arith.constant 6 : index
    %c0_62 = arith.constant 0 : index
    %91 = vector.load %arg8[%c0_60, %c0_61, %c6, %c0_62] : memref<2x2x9x16xf32, #tpu.memory_space<vmem>>, vector<1x1x1x16xf32>
    %92 = vector.shape_cast %91 : vector<1x1x1x16xf32> to vector<16xf32>
    %93 = vector.shape_cast %90 : vector<16xf32> to vector<1x1x1x16xf32>
    tpu.vector_store %arg8[%c0_60, %c0_61, %c6, %c0_62], %93 {strides = array<i32>} : memref<2x2x9x16xf32, #tpu.memory_space<vmem>>, vector<1x1x1x16xf32>,
    %cst_63 = arith.constant 0.000000e+00 : f32
    %94 = vector.broadcast %cst_63 : f32 to vector<16x16xf32>
    %95 = arith.select %21, %49, %94 : vector<16x16xi1>, vector<16x16xf32>
    %cst_64 = arith.constant dense<0.000000e+00> : vector<16xf32>
    %96 = vector.multi_reduction <add>, %95, %cst_64 [1] : vector<16x16xf32> to vector<16xf32>
    %c0_65 = arith.constant 0 : index
    %c0_66 = arith.constant 0 : index
    %c7 = arith.constant 7 : index
    %c0_67 = arith.constant 0 : index
    %97 = vector.load %arg8[%c0_65, %c0_66, %c7, %c0_67] : memref<2x2x9x16xf32, #tpu.memory_space<vmem>>, vector<1x1x1x16xf32>
    %98 = vector.shape_cast %97 : vector<1x1x1x16xf32> to vector<16xf32>
    %99 = vector.shape_cast %96 : vector<16xf32> to vector<1x1x1x16xf32>
    tpu.vector_store %arg8[%c0_65, %c0_66, %c7, %c0_67], %99 {strides = array<i32>} : memref<2x2x9x16xf32, #tpu.memory_space<vmem>>, vector<1x1x1x16xf32>,
    %cst_68 = arith.constant 0.000000e+00 : f32
    %100 = vector.broadcast %cst_68 : f32 to vector<16x16xf32>
    %101 = arith.select %23, %49, %100 : vector<16x16xi1>, vector<16x16xf32>
    %cst_69 = arith.constant dense<0.000000e+00> : vector<16xf32>
    %102 = vector.multi_reduction <add>, %101, %cst_69 [1] : vector<16x16xf32> to vector<16xf32>
    %c0_70 = arith.constant 0 : index
    %c0_71 = arith.constant 0 : index
    %c8 = arith.constant 8 : index
    %c0_72 = arith.constant 0 : index
    %103 = vector.load %arg8[%c0_70, %c0_71, %c8, %c0_72] : memref<2x2x9x16xf32, #tpu.memory_space<vmem>>, vector<1x1x1x16xf32>
    %104 = vector.shape_cast %103 : vector<1x1x1x16xf32> to vector<16xf32>
    %105 = vector.shape_cast %102 : vector<16xf32> to vector<1x1x1x16xf32>
    tpu.vector_store %arg8[%c0_70, %c0_71, %c8, %c0_72], %105 {strides = array<i32>} : memref<2x2x9x16xf32, #tpu.memory_space<vmem>>, vector<1x1x1x16xf32>,
    %c1_73 = arith.constant 1 : index
    %c0_74 = arith.constant 0 : index
    %c0_75 = arith.constant 0 : index
    %106 = vector.load %arg2[%c1_73, %c0_74, %c0_75] : memref<2x12x8xf32, #tpu.memory_space<vmem>>, vector<1x12x8xf32>
    %107 = vector.shape_cast %106 : vector<1x12x8xf32> to vector<12x8xf32>
    %cst_76 = arith.constant dense<0.000000e+00> : vector<16x8xf32>
    %108 = tpu.matmul %25, %107, %cst_76 {dimension_numbers = #tpu.dot_dimension_numbers<[1], [0], [0], [1], [0, 0, 1, 1], [], []>} : vector<16x12xf32>, vector<12x8xf32>, vector<16x8xf32> -> vector<16x8xf32>
    %c1_77 = arith.constant 1 : index
    %c0_78 = arith.constant 0 : index
    %c0_79 = arith.constant 0 : index
    %109 = vector.load %arg5[%c1_77, %c0_78, %c0_79] : memref<2x16x8xf32, #tpu.memory_space<vmem>>, vector<1x16x8xf32>
    %110 = vector.shape_cast %109 : vector<1x16x8xf32> to vector<16x8xf32>
    %111 = arith.addf %108, %110 : vector<16x8xf32>
    %c1_80 = arith.constant 1 : index
    %c0_81 = arith.constant 0 : index
    %c0_82 = arith.constant 0 : index
    %112 = vector.load %arg3[%c1_80, %c0_81, %c0_82] : memref<2x12x8xf32, #tpu.memory_space<vmem>>, vector<1x12x8xf32>
    %113 = vector.shape_cast %112 : vector<1x12x8xf32> to vector<12x8xf32>
    %cst_83 = arith.constant dense<0.000000e+00> : vector<16x8xf32>
    %114 = tpu.matmul %25, %113, %cst_83 {dimension_numbers = #tpu.dot_dimension_numbers<[1], [0], [0], [1], [0, 0, 1, 1], [], []>} : vector<16x12xf32>, vector<12x8xf32>, vector<16x8xf32> -> vector<16x8xf32>
    %c1_84 = arith.constant 1 : index
    %c0_85 = arith.constant 0 : index
    %c0_86 = arith.constant 0 : index
    %115 = vector.load %arg6[%c1_84, %c0_85, %c0_86] : memref<2x16x8xf32, #tpu.memory_space<vmem>>, vector<1x16x8xf32>
    %116 = vector.shape_cast %115 : vector<1x16x8xf32> to vector<16x8xf32>
    %117 = arith.addf %114, %116 : vector<16x8xf32>
    %c1_87 = arith.constant 1 : index
    %c0_88 = arith.constant 0 : index
    %c0_89 = arith.constant 0 : index
    %118 = vector.load %arg4[%c1_87, %c0_88, %c0_89] : memref<2x12x4xf32, #tpu.memory_space<vmem>>, vector<1x12x4xf32>
    %119 = vector.shape_cast %118 : vector<1x12x4xf32> to vector<12x4xf32>
    %cst_90 = arith.constant dense<0.000000e+00> : vector<16x4xf32>
    %120 = tpu.matmul %25, %119, %cst_90 {dimension_numbers = #tpu.dot_dimension_numbers<[1], [0], [0], [1], [0, 0, 1, 1], [], []>} : vector<16x12xf32>, vector<12x4xf32>, vector<16x4xf32> -> vector<16x4xf32>
    %c1_91 = arith.constant 1 : index
    %c0_92 = arith.constant 0 : index
    %c0_93 = arith.constant 0 : index
    %121 = vector.load %arg7[%c1_91, %c0_92, %c0_93] : memref<2x1x4xf32, #tpu.memory_space<vmem>>, vector<1x1x4xf32>
    %122 = vector.shape_cast %121 : vector<1x1x4xf32> to vector<1x4xf32>
    %123 = vector.broadcast %122 : vector<1x4xf32> to vector<16x4xf32>
    %124 = arith.addf %120, %123 : vector<16x4xf32>
    %cst_94 = arith.constant dense<0.000000e+00> : vector<16x16xf32>
    %125 = tpu.matmul %111, %117, %cst_94 {dimension_numbers = #tpu.dot_dimension_numbers<[1], [1], [0], [0], [0, 0, 1, 0], [], []>} : vector<16x8xf32>, vector<16x8xf32>, vector<16x16xf32> -> vector<16x16xf32>
    %cst_95 = arith.constant 0.000000e+00 : f32
    %126 = vector.broadcast %cst_95 : f32 to vector<16x16xf32>
    %127 = arith.select %5, %125, %126 : vector<16x16xi1>, vector<16x16xf32>
    %128 = math.tanh %127 : vector<16x16xf32>
    %cst_96 = arith.constant dense<0.000000e+00> : vector<16x4xf32>
    %129 = tpu.matmul %128, %124, %cst_96 {dimension_numbers = #tpu.dot_dimension_numbers<[1], [0], [0], [1], [0, 0, 1, 1], [], []>} : vector<16x16xf32>, vector<16x4xf32>, vector<16x4xf32> -> vector<16x4xf32>
    %130 = arith.addf %51, %129 : vector<16x4xf32>
    %cst_97 = arith.constant 0.000000e+00 : f32
    %131 = vector.broadcast %cst_97 : f32 to vector<16x16xf32>
    %132 = arith.select %7, %128, %131 : vector<16x16xi1>, vector<16x16xf32>
    %cst_98 = arith.constant dense<0.000000e+00> : vector<16xf32>
    %133 = vector.multi_reduction <add>, %132, %cst_98 [1] : vector<16x16xf32> to vector<16xf32>
    %c0_99 = arith.constant 0 : index
    %c1_100 = arith.constant 1 : index
    %c0_101 = arith.constant 0 : index
    %c0_102 = arith.constant 0 : index
    %134 = vector.load %arg8[%c0_99, %c1_100, %c0_101, %c0_102] : memref<2x2x9x16xf32, #tpu.memory_space<vmem>>, vector<1x1x1x16xf32>
    %135 = vector.shape_cast %134 : vector<1x1x1x16xf32> to vector<16xf32>
    %136 = vector.shape_cast %133 : vector<16xf32> to vector<1x1x1x16xf32>
    tpu.vector_store %arg8[%c0_99, %c1_100, %c0_101, %c0_102], %136 {strides = array<i32>} : memref<2x2x9x16xf32, #tpu.memory_space<vmem>>, vector<1x1x1x16xf32>,
    %cst_103 = arith.constant 0.000000e+00 : f32
    %137 = vector.broadcast %cst_103 : f32 to vector<16x16xf32>
    %138 = arith.select %9, %128, %137 : vector<16x16xi1>, vector<16x16xf32>
    %cst_104 = arith.constant dense<0.000000e+00> : vector<16xf32>
    %139 = vector.multi_reduction <add>, %138, %cst_104 [1] : vector<16x16xf32> to vector<16xf32>
    %c0_105 = arith.constant 0 : index
    %c1_106 = arith.constant 1 : index
    %c1_107 = arith.constant 1 : index
    %c0_108 = arith.constant 0 : index
    %140 = vector.load %arg8[%c0_105, %c1_106, %c1_107, %c0_108] : memref<2x2x9x16xf32, #tpu.memory_space<vmem>>, vector<1x1x1x16xf32>
    %141 = vector.shape_cast %140 : vector<1x1x1x16xf32> to vector<16xf32>
    %142 = vector.shape_cast %139 : vector<16xf32> to vector<1x1x1x16xf32>
    tpu.vector_store %arg8[%c0_105, %c1_106, %c1_107, %c0_108], %142 {strides = array<i32>} : memref<2x2x9x16xf32, #tpu.memory_space<vmem>>, vector<1x1x1x16xf32>,
    %cst_109 = arith.constant 0.000000e+00 : f32
    %143 = vector.broadcast %cst_109 : f32 to vector<16x16xf32>
    %144 = arith.select %11, %128, %143 : vector<16x16xi1>, vector<16x16xf32>
    %cst_110 = arith.constant dense<0.000000e+00> : vector<16xf32>
    %145 = vector.multi_reduction <add>, %144, %cst_110 [1] : vector<16x16xf32> to vector<16xf32>
    %c0_111 = arith.constant 0 : index
    %c1_112 = arith.constant 1 : index
    %c2_113 = arith.constant 2 : index
    %c0_114 = arith.constant 0 : index
    %146 = vector.load %arg8[%c0_111, %c1_112, %c2_113, %c0_114] : memref<2x2x9x16xf32, #tpu.memory_space<vmem>>, vector<1x1x1x16xf32>
    %147 = vector.shape_cast %146 : vector<1x1x1x16xf32> to vector<16xf32>
    %148 = vector.shape_cast %145 : vector<16xf32> to vector<1x1x1x16xf32>
    tpu.vector_store %arg8[%c0_111, %c1_112, %c2_113, %c0_114], %148 {strides = array<i32>} : memref<2x2x9x16xf32, #tpu.memory_space<vmem>>, vector<1x1x1x16xf32>,
    %cst_115 = arith.constant 0.000000e+00 : f32
    %149 = vector.broadcast %cst_115 : f32 to vector<16x16xf32>
    %150 = arith.select %13, %128, %149 : vector<16x16xi1>, vector<16x16xf32>
    %cst_116 = arith.constant dense<0.000000e+00> : vector<16xf32>
    %151 = vector.multi_reduction <add>, %150, %cst_116 [1] : vector<16x16xf32> to vector<16xf32>
    %c0_117 = arith.constant 0 : index
    %c1_118 = arith.constant 1 : index
    %c3_119 = arith.constant 3 : index
    %c0_120 = arith.constant 0 : index
    %152 = vector.load %arg8[%c0_117, %c1_118, %c3_119, %c0_120] : memref<2x2x9x16xf32, #tpu.memory_space<vmem>>, vector<1x1x1x16xf32>
    %153 = vector.shape_cast %152 : vector<1x1x1x16xf32> to vector<16xf32>
    %154 = vector.shape_cast %151 : vector<16xf32> to vector<1x1x1x16xf32>
    tpu.vector_store %arg8[%c0_117, %c1_118, %c3_119, %c0_120], %154 {strides = array<i32>} : memref<2x2x9x16xf32, #tpu.memory_space<vmem>>, vector<1x1x1x16xf32>,
    %cst_121 = arith.constant 0.000000e+00 : f32
    %155 = vector.broadcast %cst_121 : f32 to vector<16x16xf32>
    %156 = arith.select %15, %128, %155 : vector<16x16xi1>, vector<16x16xf32>
    %cst_122 = arith.constant dense<0.000000e+00> : vector<16xf32>
    %157 = vector.multi_reduction <add>, %156, %cst_122 [1] : vector<16x16xf32> to vector<16xf32>
    %c0_123 = arith.constant 0 : index
    %c1_124 = arith.constant 1 : index
    %c4_125 = arith.constant 4 : index
    %c0_126 = arith.constant 0 : index
    %158 = vector.load %arg8[%c0_123, %c1_124, %c4_125, %c0_126] : memref<2x2x9x16xf32, #tpu.memory_space<vmem>>, vector<1x1x1x16xf32>
    %159 = vector.shape_cast %158 : vector<1x1x1x16xf32> to vector<16xf32>
    %160 = vector.shape_cast %157 : vector<16xf32> to vector<1x1x1x16xf32>
    tpu.vector_store %arg8[%c0_123, %c1_124, %c4_125, %c0_126], %160 {strides = array<i32>} : memref<2x2x9x16xf32, #tpu.memory_space<vmem>>, vector<1x1x1x16xf32>,
    %cst_127 = arith.constant 0.000000e+00 : f32
    %161 = vector.broadcast %cst_127 : f32 to vector<16x16xf32>
    %162 = arith.select %17, %128, %161 : vector<16x16xi1>, vector<16x16xf32>
    %cst_128 = arith.constant dense<0.000000e+00> : vector<16xf32>
    %163 = vector.multi_reduction <add>, %162, %cst_128 [1] : vector<16x16xf32> to vector<16xf32>
    %c0_129 = arith.constant 0 : index
    %c1_130 = arith.constant 1 : index
    %c5_131 = arith.constant 5 : index
    %c0_132 = arith.constant 0 : index
    %164 = vector.load %arg8[%c0_129, %c1_130, %c5_131, %c0_132] : memref<2x2x9x16xf32, #tpu.memory_space<vmem>>, vector<1x1x1x16xf32>
    %165 = vector.shape_cast %164 : vector<1x1x1x16xf32> to vector<16xf32>
    %166 = vector.shape_cast %163 : vector<16xf32> to vector<1x1x1x16xf32>
    tpu.vector_store %arg8[%c0_129, %c1_130, %c5_131, %c0_132], %166 {strides = array<i32>} : memref<2x2x9x16xf32, #tpu.memory_space<vmem>>, vector<1x1x1x16xf32>,
    %cst_133 = arith.constant 0.000000e+00 : f32
    %167 = vector.broadcast %cst_133 : f32 to vector<16x16xf32>
    %168 = arith.select %19, %128, %167 : vector<16x16xi1>, vector<16x16xf32>
    %cst_134 = arith.constant dense<0.000000e+00> : vector<16xf32>
    %169 = vector.multi_reduction <add>, %168, %cst_134 [1] : vector<16x16xf32> to vector<16xf32>
    %c0_135 = arith.constant 0 : index
    %c1_136 = arith.constant 1 : index
    %c6_137 = arith.constant 6 : index
    %c0_138 = arith.constant 0 : index
    %170 = vector.load %arg8[%c0_135, %c1_136, %c6_137, %c0_138] : memref<2x2x9x16xf32, #tpu.memory_space<vmem>>, vector<1x1x1x16xf32>
    %171 = vector.shape_cast %170 : vector<1x1x1x16xf32> to vector<16xf32>
    %172 = vector.shape_cast %169 : vector<16xf32> to vector<1x1x1x16xf32>
    tpu.vector_store %arg8[%c0_135, %c1_136, %c6_137, %c0_138], %172 {strides = array<i32>} : memref<2x2x9x16xf32, #tpu.memory_space<vmem>>, vector<1x1x1x16xf32>,
    %cst_139 = arith.constant 0.000000e+00 : f32
    %173 = vector.broadcast %cst_139 : f32 to vector<16x16xf32>
    %174 = arith.select %21, %128, %173 : vector<16x16xi1>, vector<16x16xf32>
    %cst_140 = arith.constant dense<0.000000e+00> : vector<16xf32>
    %175 = vector.multi_reduction <add>, %174, %cst_140 [1] : vector<16x16xf32> to vector<16xf32>
    %c0_141 = arith.constant 0 : index
    %c1_142 = arith.constant 1 : index
    %c7_143 = arith.constant 7 : index
    %c0_144 = arith.constant 0 : index
    %176 = vector.load %arg8[%c0_141, %c1_142, %c7_143, %c0_144] : memref<2x2x9x16xf32, #tpu.memory_space<vmem>>, vector<1x1x1x16xf32>
    %177 = vector.shape_cast %176 : vector<1x1x1x16xf32> to vector<16xf32>
    %178 = vector.shape_cast %175 : vector<16xf32> to vector<1x1x1x16xf32>
    tpu.vector_store %arg8[%c0_141, %c1_142, %c7_143, %c0_144], %178 {strides = array<i32>} : memref<2x2x9x16xf32, #tpu.memory_space<vmem>>, vector<1x1x1x16xf32>,
    %cst_145 = arith.constant 0.000000e+00 : f32
    %179 = vector.broadcast %cst_145 : f32 to vector<16x16xf32>
    %180 = arith.select %23, %128, %179 : vector<16x16xi1>, vector<16x16xf32>
    %cst_146 = arith.constant dense<0.000000e+00> : vector<16xf32>
    %181 = vector.multi_reduction <add>, %180, %cst_146 [1] : vector<16x16xf32> to vector<16xf32>
    %c0_147 = arith.constant 0 : index
    %c1_148 = arith.constant 1 : index
    %c8_149 = arith.constant 8 : index
    %c0_150 = arith.constant 0 : index
    %182 = vector.load %arg8[%c0_147, %c1_148, %c8_149, %c0_150] : memref<2x2x9x16xf32, #tpu.memory_space<vmem>>, vector<1x1x1x16xf32>
    %183 = vector.shape_cast %182 : vector<1x1x1x16xf32> to vector<16xf32>
    %184 = vector.shape_cast %181 : vector<16xf32> to vector<1x1x1x16xf32>
    tpu.vector_store %arg8[%c0_147, %c1_148, %c8_149, %c0_150], %184 {strides = array<i32>} : memref<2x2x9x16xf32, #tpu.memory_space<vmem>>, vector<1x1x1x16xf32>,
    %c0_151 = arith.constant 0 : index
    %c0_152 = arith.constant 0 : index
    %c0_153 = arith.constant 0 : index
    %185 = vector.load %arg9[%c0_151, %c0_152, %c0_153] : memref<2x16x4xf32, #tpu.memory_space<vmem>>, vector<1x16x4xf32>
    %186 = vector.shape_cast %185 : vector<1x16x4xf32> to vector<16x4xf32>
    %187 = vector.shape_cast %130 : vector<16x4xf32> to vector<1x16x4xf32>
    tpu.vector_store %arg9[%c0_151, %c0_152, %c0_153], %187 {strides = array<i32>} : memref<2x16x4xf32, #tpu.memory_space<vmem>>, vector<1x16x4xf32>,
    %c1_154 = arith.constant 1 : index
    %c0_155 = arith.constant 0 : index
    %c0_156 = arith.constant 0 : index
    %188 = vector.load %arg1[%c1_154, %c0_155, %c0_156] : memref<2x16x12xf32, #tpu.memory_space<vmem>>, vector<1x16x12xf32>
    %189 = vector.shape_cast %188 : vector<1x16x12xf32> to vector<16x12xf32>
    %cst_157 = arith.constant 0.000000e+00 : f32
    %190 = vector.broadcast %cst_157 : f32 to vector<16x4xf32>
    %c0_158 = arith.constant 0 : index
    %c0_159 = arith.constant 0 : index
    %c0_160 = arith.constant 0 : index
    %191 = vector.load %arg2[%c0_158, %c0_159, %c0_160] : memref<2x12x8xf32, #tpu.memory_space<vmem>>, vector<1x12x8xf32>
    %192 = vector.shape_cast %191 : vector<1x12x8xf32> to vector<12x8xf32>
    %cst_161 = arith.constant dense<0.000000e+00> : vector<16x8xf32>
    %193 = tpu.matmul %189, %192, %cst_161 {dimension_numbers = #tpu.dot_dimension_numbers<[1], [0], [0], [1], [0, 0, 1, 1], [], []>} : vector<16x12xf32>, vector<12x8xf32>, vector<16x8xf32> -> vector<16x8xf32>
    %c0_162 = arith.constant 0 : index
    %c0_163 = arith.constant 0 : index
    %c0_164 = arith.constant 0 : index
    %194 = vector.load %arg5[%c0_162, %c0_163, %c0_164] : memref<2x16x8xf32, #tpu.memory_space<vmem>>, vector<1x16x8xf32>
    %195 = vector.shape_cast %194 : vector<1x16x8xf32> to vector<16x8xf32>
    %196 = arith.addf %193, %195 : vector<16x8xf32>
    %c0_165 = arith.constant 0 : index
    %c0_166 = arith.constant 0 : index
    %c0_167 = arith.constant 0 : index
    %197 = vector.load %arg3[%c0_165, %c0_166, %c0_167] : memref<2x12x8xf32, #tpu.memory_space<vmem>>, vector<1x12x8xf32>
    %198 = vector.shape_cast %197 : vector<1x12x8xf32> to vector<12x8xf32>
    %cst_168 = arith.constant dense<0.000000e+00> : vector<16x8xf32>
    %199 = tpu.matmul %189, %198, %cst_168 {dimension_numbers = #tpu.dot_dimension_numbers<[1], [0], [0], [1], [0, 0, 1, 1], [], []>} : vector<16x12xf32>, vector<12x8xf32>, vector<16x8xf32> -> vector<16x8xf32>
    %c0_169 = arith.constant 0 : index
    %c0_170 = arith.constant 0 : index
    %c0_171 = arith.constant 0 : index
    %200 = vector.load %arg6[%c0_169, %c0_170, %c0_171] : memref<2x16x8xf32, #tpu.memory_space<vmem>>, vector<1x16x8xf32>
    %201 = vector.shape_cast %200 : vector<1x16x8xf32> to vector<16x8xf32>
    %202 = arith.addf %199, %201 : vector<16x8xf32>
    %c0_172 = arith.constant 0 : index
    %c0_173 = arith.constant 0 : index
    %c0_174 = arith.constant 0 : index
    %203 = vector.load %arg4[%c0_172, %c0_173, %c0_174] : memref<2x12x4xf32, #tpu.memory_space<vmem>>, vector<1x12x4xf32>
    %204 = vector.shape_cast %203 : vector<1x12x4xf32> to vector<12x4xf32>
    %cst_175 = arith.constant dense<0.000000e+00> : vector<16x4xf32>
    %205 = tpu.matmul %189, %204, %cst_175 {dimension_numbers = #tpu.dot_dimension_numbers<[1], [0], [0], [1], [0, 0, 1, 1], [], []>} : vector<16x12xf32>, vector<12x4xf32>, vector<16x4xf32> -> vector<16x4xf32>
    %c0_176 = arith.constant 0 : index
    %c0_177 = arith.constant 0 : index
    %c0_178 = arith.constant 0 : index
    %206 = vector.load %arg7[%c0_176, %c0_177, %c0_178] : memref<2x1x4xf32, #tpu.memory_space<vmem>>, vector<1x1x4xf32>
    %207 = vector.shape_cast %206 : vector<1x1x4xf32> to vector<1x4xf32>
    %208 = vector.broadcast %207 : vector<1x4xf32> to vector<16x4xf32>
    %209 = arith.addf %205, %208 : vector<16x4xf32>
    %cst_179 = arith.constant dense<0.000000e+00> : vector<16x16xf32>
    %210 = tpu.matmul %196, %202, %cst_179 {dimension_numbers = #tpu.dot_dimension_numbers<[1], [1], [0], [0], [0, 0, 1, 0], [], []>} : vector<16x8xf32>, vector<16x8xf32>, vector<16x16xf32> -> vector<16x16xf32>
    %cst_180 = arith.constant 0.000000e+00 : f32
    %211 = vector.broadcast %cst_180 : f32 to vector<16x16xf32>
    %212 = arith.select %5, %210, %211 : vector<16x16xi1>, vector<16x16xf32>
    %213 = math.tanh %212 : vector<16x16xf32>
    %cst_181 = arith.constant dense<0.000000e+00> : vector<16x4xf32>
    %214 = tpu.matmul %213, %209, %cst_181 {dimension_numbers = #tpu.dot_dimension_numbers<[1], [0], [0], [1], [0, 0, 1, 1], [], []>} : vector<16x16xf32>, vector<16x4xf32>, vector<16x4xf32> -> vector<16x4xf32>
    %215 = arith.addf %190, %214 : vector<16x4xf32>
    %cst_182 = arith.constant 0.000000e+00 : f32
    %216 = vector.broadcast %cst_182 : f32 to vector<16x16xf32>
    %217 = arith.select %7, %213, %216 : vector<16x16xi1>, vector<16x16xf32>
    %cst_183 = arith.constant dense<0.000000e+00> : vector<16xf32>
    %218 = vector.multi_reduction <add>, %217, %cst_183 [1] : vector<16x16xf32> to vector<16xf32>
    %c1_184 = arith.constant 1 : index
    %c0_185 = arith.constant 0 : index
    %c0_186 = arith.constant 0 : index
    %c0_187 = arith.constant 0 : index
    %219 = vector.load %arg8[%c1_184, %c0_185, %c0_186, %c0_187] : memref<2x2x9x16xf32, #tpu.memory_space<vmem>>, vector<1x1x1x16xf32>
    %220 = vector.shape_cast %219 : vector<1x1x1x16xf32> to vector<16xf32>
    %221 = vector.shape_cast %218 : vector<16xf32> to vector<1x1x1x16xf32>
    tpu.vector_store %arg8[%c1_184, %c0_185, %c0_186, %c0_187], %221 {strides = array<i32>} : memref<2x2x9x16xf32, #tpu.memory_space<vmem>>, vector<1x1x1x16xf32>,
    %cst_188 = arith.constant 0.000000e+00 : f32
    %222 = vector.broadcast %cst_188 : f32 to vector<16x16xf32>
    %223 = arith.select %9, %213, %222 : vector<16x16xi1>, vector<16x16xf32>
    %cst_189 = arith.constant dense<0.000000e+00> : vector<16xf32>
    %224 = vector.multi_reduction <add>, %223, %cst_189 [1] : vector<16x16xf32> to vector<16xf32>
    %c1_190 = arith.constant 1 : index
    %c0_191 = arith.constant 0 : index
    %c1_192 = arith.constant 1 : index
    %c0_193 = arith.constant 0 : index
    %225 = vector.load %arg8[%c1_190, %c0_191, %c1_192, %c0_193] : memref<2x2x9x16xf32, #tpu.memory_space<vmem>>, vector<1x1x1x16xf32>
    %226 = vector.shape_cast %225 : vector<1x1x1x16xf32> to vector<16xf32>
    %227 = vector.shape_cast %224 : vector<16xf32> to vector<1x1x1x16xf32>
    tpu.vector_store %arg8[%c1_190, %c0_191, %c1_192, %c0_193], %227 {strides = array<i32>} : memref<2x2x9x16xf32, #tpu.memory_space<vmem>>, vector<1x1x1x16xf32>,
    %cst_194 = arith.constant 0.000000e+00 : f32
    %228 = vector.broadcast %cst_194 : f32 to vector<16x16xf32>
    %229 = arith.select %11, %213, %228 : vector<16x16xi1>, vector<16x16xf32>
    %cst_195 = arith.constant dense<0.000000e+00> : vector<16xf32>
    %230 = vector.multi_reduction <add>, %229, %cst_195 [1] : vector<16x16xf32> to vector<16xf32>
    %c1_196 = arith.constant 1 : index
    %c0_197 = arith.constant 0 : index
    %c2_198 = arith.constant 2 : index
    %c0_199 = arith.constant 0 : index
    %231 = vector.load %arg8[%c1_196, %c0_197, %c2_198, %c0_199] : memref<2x2x9x16xf32, #tpu.memory_space<vmem>>, vector<1x1x1x16xf32>
    %232 = vector.shape_cast %231 : vector<1x1x1x16xf32> to vector<16xf32>
    %233 = vector.shape_cast %230 : vector<16xf32> to vector<1x1x1x16xf32>
    tpu.vector_store %arg8[%c1_196, %c0_197, %c2_198, %c0_199], %233 {strides = array<i32>} : memref<2x2x9x16xf32, #tpu.memory_space<vmem>>, vector<1x1x1x16xf32>,
    %cst_200 = arith.constant 0.000000e+00 : f32
    %234 = vector.broadcast %cst_200 : f32 to vector<16x16xf32>
    %235 = arith.select %13, %213, %234 : vector<16x16xi1>, vector<16x16xf32>
    %cst_201 = arith.constant dense<0.000000e+00> : vector<16xf32>
    %236 = vector.multi_reduction <add>, %235, %cst_201 [1] : vector<16x16xf32> to vector<16xf32>
    %c1_202 = arith.constant 1 : index
    %c0_203 = arith.constant 0 : index
    %c3_204 = arith.constant 3 : index
    %c0_205 = arith.constant 0 : index
    %237 = vector.load %arg8[%c1_202, %c0_203, %c3_204, %c0_205] : memref<2x2x9x16xf32, #tpu.memory_space<vmem>>, vector<1x1x1x16xf32>
    %238 = vector.shape_cast %237 : vector<1x1x1x16xf32> to vector<16xf32>
    %239 = vector.shape_cast %236 : vector<16xf32> to vector<1x1x1x16xf32>
    tpu.vector_store %arg8[%c1_202, %c0_203, %c3_204, %c0_205], %239 {strides = array<i32>} : memref<2x2x9x16xf32, #tpu.memory_space<vmem>>, vector<1x1x1x16xf32>,
    %cst_206 = arith.constant 0.000000e+00 : f32
    %240 = vector.broadcast %cst_206 : f32 to vector<16x16xf32>
    %241 = arith.select %15, %213, %240 : vector<16x16xi1>, vector<16x16xf32>
    %cst_207 = arith.constant dense<0.000000e+00> : vector<16xf32>
    %242 = vector.multi_reduction <add>, %241, %cst_207 [1] : vector<16x16xf32> to vector<16xf32>
    %c1_208 = arith.constant 1 : index
    %c0_209 = arith.constant 0 : index
    %c4_210 = arith.constant 4 : index
    %c0_211 = arith.constant 0 : index
    %243 = vector.load %arg8[%c1_208, %c0_209, %c4_210, %c0_211] : memref<2x2x9x16xf32, #tpu.memory_space<vmem>>, vector<1x1x1x16xf32>
    %244 = vector.shape_cast %243 : vector<1x1x1x16xf32> to vector<16xf32>
    %245 = vector.shape_cast %242 : vector<16xf32> to vector<1x1x1x16xf32>
    tpu.vector_store %arg8[%c1_208, %c0_209, %c4_210, %c0_211], %245 {strides = array<i32>} : memref<2x2x9x16xf32, #tpu.memory_space<vmem>>, vector<1x1x1x16xf32>,
    %cst_212 = arith.constant 0.000000e+00 : f32
    %246 = vector.broadcast %cst_212 : f32 to vector<16x16xf32>
    %247 = arith.select %17, %213, %246 : vector<16x16xi1>, vector<16x16xf32>
    %cst_213 = arith.constant dense<0.000000e+00> : vector<16xf32>
    %248 = vector.multi_reduction <add>, %247, %cst_213 [1] : vector<16x16xf32> to vector<16xf32>
    %c1_214 = arith.constant 1 : index
    %c0_215 = arith.constant 0 : index
    %c5_216 = arith.constant 5 : index
    %c0_217 = arith.constant 0 : index
    %249 = vector.load %arg8[%c1_214, %c0_215, %c5_216, %c0_217] : memref<2x2x9x16xf32, #tpu.memory_space<vmem>>, vector<1x1x1x16xf32>
    %250 = vector.shape_cast %249 : vector<1x1x1x16xf32> to vector<16xf32>
    %251 = vector.shape_cast %248 : vector<16xf32> to vector<1x1x1x16xf32>
    tpu.vector_store %arg8[%c1_214, %c0_215, %c5_216, %c0_217], %251 {strides = array<i32>} : memref<2x2x9x16xf32, #tpu.memory_space<vmem>>, vector<1x1x1x16xf32>,
    %cst_218 = arith.constant 0.000000e+00 : f32
    %252 = vector.broadcast %cst_218 : f32 to vector<16x16xf32>
    %253 = arith.select %19, %213, %252 : vector<16x16xi1>, vector<16x16xf32>
    %cst_219 = arith.constant dense<0.000000e+00> : vector<16xf32>
    %254 = vector.multi_reduction <add>, %253, %cst_219 [1] : vector<16x16xf32> to vector<16xf32>
    %c1_220 = arith.constant 1 : index
    %c0_221 = arith.constant 0 : index
    %c6_222 = arith.constant 6 : index
    %c0_223 = arith.constant 0 : index
    %255 = vector.load %arg8[%c1_220, %c0_221, %c6_222, %c0_223] : memref<2x2x9x16xf32, #tpu.memory_space<vmem>>, vector<1x1x1x16xf32>
    %256 = vector.shape_cast %255 : vector<1x1x1x16xf32> to vector<16xf32>
    %257 = vector.shape_cast %254 : vector<16xf32> to vector<1x1x1x16xf32>
    tpu.vector_store %arg8[%c1_220, %c0_221, %c6_222, %c0_223], %257 {strides = array<i32>} : memref<2x2x9x16xf32, #tpu.memory_space<vmem>>, vector<1x1x1x16xf32>,
    %cst_224 = arith.constant 0.000000e+00 : f32
    %258 = vector.broadcast %cst_224 : f32 to vector<16x16xf32>
    %259 = arith.select %21, %213, %258 : vector<16x16xi1>, vector<16x16xf32>
    %cst_225 = arith.constant dense<0.000000e+00> : vector<16xf32>
    %260 = vector.multi_reduction <add>, %259, %cst_225 [1] : vector<16x16xf32> to vector<16xf32>
    %c1_226 = arith.constant 1 : index
    %c0_227 = arith.constant 0 : index
    %c7_228 = arith.constant 7 : index
    %c0_229 = arith.constant 0 : index
    %261 = vector.load %arg8[%c1_226, %c0_227, %c7_228, %c0_229] : memref<2x2x9x16xf32, #tpu.memory_space<vmem>>, vector<1x1x1x16xf32>
    %262 = vector.shape_cast %261 : vector<1x1x1x16xf32> to vector<16xf32>
    %263 = vector.shape_cast %260 : vector<16xf32> to vector<1x1x1x16xf32>
    tpu.vector_store %arg8[%c1_226, %c0_227, %c7_228, %c0_229], %263 {strides = array<i32>} : memref<2x2x9x16xf32, #tpu.memory_space<vmem>>, vector<1x1x1x16xf32>,
    %cst_230 = arith.constant 0.000000e+00 : f32
    %264 = vector.broadcast %cst_230 : f32 to vector<16x16xf32>
    %265 = arith.select %23, %213, %264 : vector<16x16xi1>, vector<16x16xf32>
    %cst_231 = arith.constant dense<0.000000e+00> : vector<16xf32>
    %266 = vector.multi_reduction <add>, %265, %cst_231 [1] : vector<16x16xf32> to vector<16xf32>
    %c1_232 = arith.constant 1 : index
    %c0_233 = arith.constant 0 : index
    %c8_234 = arith.constant 8 : index
    %c0_235 = arith.constant 0 : index
    %267 = vector.load %arg8[%c1_232, %c0_233, %c8_234, %c0_235] : memref<2x2x9x16xf32, #tpu.memory_space<vmem>>, vector<1x1x1x16xf32>
    %268 = vector.shape_cast %267 : vector<1x1x1x16xf32> to vector<16xf32>
    %269 = vector.shape_cast %266 : vector<16xf32> to vector<1x1x1x16xf32>
    tpu.vector_store %arg8[%c1_232, %c0_233, %c8_234, %c0_235], %269 {strides = array<i32>} : memref<2x2x9x16xf32, #tpu.memory_space<vmem>>, vector<1x1x1x16xf32>,
    %c1_236 = arith.constant 1 : index
    %c0_237 = arith.constant 0 : index
    %c0_238 = arith.constant 0 : index
    %270 = vector.load %arg2[%c1_236, %c0_237, %c0_238] : memref<2x12x8xf32, #tpu.memory_space<vmem>>, vector<1x12x8xf32>
    %271 = vector.shape_cast %270 : vector<1x12x8xf32> to vector<12x8xf32>
    %cst_239 = arith.constant dense<0.000000e+00> : vector<16x8xf32>
    %272 = tpu.matmul %189, %271, %cst_239 {dimension_numbers = #tpu.dot_dimension_numbers<[1], [0], [0], [1], [0, 0, 1, 1], [], []>} : vector<16x12xf32>, vector<12x8xf32>, vector<16x8xf32> -> vector<16x8xf32>
    %c1_240 = arith.constant 1 : index
    %c0_241 = arith.constant 0 : index
    %c0_242 = arith.constant 0 : index
    %273 = vector.load %arg5[%c1_240, %c0_241, %c0_242] : memref<2x16x8xf32, #tpu.memory_space<vmem>>, vector<1x16x8xf32>
    %274 = vector.shape_cast %273 : vector<1x16x8xf32> to vector<16x8xf32>
    %275 = arith.addf %272, %274 : vector<16x8xf32>
    %c1_243 = arith.constant 1 : index
    %c0_244 = arith.constant 0 : index
    %c0_245 = arith.constant 0 : index
    %276 = vector.load %arg3[%c1_243, %c0_244, %c0_245] : memref<2x12x8xf32, #tpu.memory_space<vmem>>, vector<1x12x8xf32>
    %277 = vector.shape_cast %276 : vector<1x12x8xf32> to vector<12x8xf32>
    %cst_246 = arith.constant dense<0.000000e+00> : vector<16x8xf32>
    %278 = tpu.matmul %189, %277, %cst_246 {dimension_numbers = #tpu.dot_dimension_numbers<[1], [0], [0], [1], [0, 0, 1, 1], [], []>} : vector<16x12xf32>, vector<12x8xf32>, vector<16x8xf32> -> vector<16x8xf32>
    %c1_247 = arith.constant 1 : index
    %c0_248 = arith.constant 0 : index
    %c0_249 = arith.constant 0 : index
    %279 = vector.load %arg6[%c1_247, %c0_248, %c0_249] : memref<2x16x8xf32, #tpu.memory_space<vmem>>, vector<1x16x8xf32>
    %280 = vector.shape_cast %279 : vector<1x16x8xf32> to vector<16x8xf32>
    %281 = arith.addf %278, %280 : vector<16x8xf32>
    %c1_250 = arith.constant 1 : index
    %c0_251 = arith.constant 0 : index
    %c0_252 = arith.constant 0 : index
    %282 = vector.load %arg4[%c1_250, %c0_251, %c0_252] : memref<2x12x4xf32, #tpu.memory_space<vmem>>, vector<1x12x4xf32>
    %283 = vector.shape_cast %282 : vector<1x12x4xf32> to vector<12x4xf32>
    %cst_253 = arith.constant dense<0.000000e+00> : vector<16x4xf32>
    %284 = tpu.matmul %189, %283, %cst_253 {dimension_numbers = #tpu.dot_dimension_numbers<[1], [0], [0], [1], [0, 0, 1, 1], [], []>} : vector<16x12xf32>, vector<12x4xf32>, vector<16x4xf32> -> vector<16x4xf32>
    %c1_254 = arith.constant 1 : index
    %c0_255 = arith.constant 0 : index
    %c0_256 = arith.constant 0 : index
    %285 = vector.load %arg7[%c1_254, %c0_255, %c0_256] : memref<2x1x4xf32, #tpu.memory_space<vmem>>, vector<1x1x4xf32>
    %286 = vector.shape_cast %285 : vector<1x1x4xf32> to vector<1x4xf32>
    %287 = vector.broadcast %286 : vector<1x4xf32> to vector<16x4xf32>
    %288 = arith.addf %284, %287 : vector<16x4xf32>
    %cst_257 = arith.constant dense<0.000000e+00> : vector<16x16xf32>
    %289 = tpu.matmul %275, %281, %cst_257 {dimension_numbers = #tpu.dot_dimension_numbers<[1], [1], [0], [0], [0, 0, 1, 0], [], []>} : vector<16x8xf32>, vector<16x8xf32>, vector<16x16xf32> -> vector<16x16xf32>
    %cst_258 = arith.constant 0.000000e+00 : f32
    %290 = vector.broadcast %cst_258 : f32 to vector<16x16xf32>
    %291 = arith.select %5, %289, %290 : vector<16x16xi1>, vector<16x16xf32>
    %292 = math.tanh %291 : vector<16x16xf32>
    %cst_259 = arith.constant dense<0.000000e+00> : vector<16x4xf32>
    %293 = tpu.matmul %292, %288, %cst_259 {dimension_numbers = #tpu.dot_dimension_numbers<[1], [0], [0], [1], [0, 0, 1, 1], [], []>} : vector<16x16xf32>, vector<16x4xf32>, vector<16x4xf32> -> vector<16x4xf32>
    %294 = arith.addf %215, %293 : vector<16x4xf32>
    %cst_260 = arith.constant 0.000000e+00 : f32
    %295 = vector.broadcast %cst_260 : f32 to vector<16x16xf32>
    %296 = arith.select %7, %292, %295 : vector<16x16xi1>, vector<16x16xf32>
    %cst_261 = arith.constant dense<0.000000e+00> : vector<16xf32>
    %297 = vector.multi_reduction <add>, %296, %cst_261 [1] : vector<16x16xf32> to vector<16xf32>
    %c1_262 = arith.constant 1 : index
    %c1_263 = arith.constant 1 : index
    %c0_264 = arith.constant 0 : index
    %c0_265 = arith.constant 0 : index
    %298 = vector.load %arg8[%c1_262, %c1_263, %c0_264, %c0_265] : memref<2x2x9x16xf32, #tpu.memory_space<vmem>>, vector<1x1x1x16xf32>
    %299 = vector.shape_cast %298 : vector<1x1x1x16xf32> to vector<16xf32>
    %300 = vector.shape_cast %297 : vector<16xf32> to vector<1x1x1x16xf32>
    tpu.vector_store %arg8[%c1_262, %c1_263, %c0_264, %c0_265], %300 {strides = array<i32>} : memref<2x2x9x16xf32, #tpu.memory_space<vmem>>, vector<1x1x1x16xf32>,
    %cst_266 = arith.constant 0.000000e+00 : f32
    %301 = vector.broadcast %cst_266 : f32 to vector<16x16xf32>
    %302 = arith.select %9, %292, %301 : vector<16x16xi1>, vector<16x16xf32>
    %cst_267 = arith.constant dense<0.000000e+00> : vector<16xf32>
    %303 = vector.multi_reduction <add>, %302, %cst_267 [1] : vector<16x16xf32> to vector<16xf32>
    %c1_268 = arith.constant 1 : index
    %c1_269 = arith.constant 1 : index
    %c1_270 = arith.constant 1 : index
    %c0_271 = arith.constant 0 : index
    %304 = vector.load %arg8[%c1_268, %c1_269, %c1_270, %c0_271] : memref<2x2x9x16xf32, #tpu.memory_space<vmem>>, vector<1x1x1x16xf32>
    %305 = vector.shape_cast %304 : vector<1x1x1x16xf32> to vector<16xf32>
    %306 = vector.shape_cast %303 : vector<16xf32> to vector<1x1x1x16xf32>
    tpu.vector_store %arg8[%c1_268, %c1_269, %c1_270, %c0_271], %306 {strides = array<i32>} : memref<2x2x9x16xf32, #tpu.memory_space<vmem>>, vector<1x1x1x16xf32>,
    %cst_272 = arith.constant 0.000000e+00 : f32
    %307 = vector.broadcast %cst_272 : f32 to vector<16x16xf32>
    %308 = arith.select %11, %292, %307 : vector<16x16xi1>, vector<16x16xf32>
    %cst_273 = arith.constant dense<0.000000e+00> : vector<16xf32>
    %309 = vector.multi_reduction <add>, %308, %cst_273 [1] : vector<16x16xf32> to vector<16xf32>
    %c1_274 = arith.constant 1 : index
    %c1_275 = arith.constant 1 : index
    %c2_276 = arith.constant 2 : index
    %c0_277 = arith.constant 0 : index
    %310 = vector.load %arg8[%c1_274, %c1_275, %c2_276, %c0_277] : memref<2x2x9x16xf32, #tpu.memory_space<vmem>>, vector<1x1x1x16xf32>
    %311 = vector.shape_cast %310 : vector<1x1x1x16xf32> to vector<16xf32>
    %312 = vector.shape_cast %309 : vector<16xf32> to vector<1x1x1x16xf32>
    tpu.vector_store %arg8[%c1_274, %c1_275, %c2_276, %c0_277], %312 {strides = array<i32>} : memref<2x2x9x16xf32, #tpu.memory_space<vmem>>, vector<1x1x1x16xf32>,
    %cst_278 = arith.constant 0.000000e+00 : f32
    %313 = vector.broadcast %cst_278 : f32 to vector<16x16xf32>
    %314 = arith.select %13, %292, %313 : vector<16x16xi1>, vector<16x16xf32>
    %cst_279 = arith.constant dense<0.000000e+00> : vector<16xf32>
    %315 = vector.multi_reduction <add>, %314, %cst_279 [1] : vector<16x16xf32> to vector<16xf32>
    %c1_280 = arith.constant 1 : index
    %c1_281 = arith.constant 1 : index
    %c3_282 = arith.constant 3 : index
    %c0_283 = arith.constant 0 : index
    %316 = vector.load %arg8[%c1_280, %c1_281, %c3_282, %c0_283] : memref<2x2x9x16xf32, #tpu.memory_space<vmem>>, vector<1x1x1x16xf32>
    %317 = vector.shape_cast %316 : vector<1x1x1x16xf32> to vector<16xf32>
    %318 = vector.shape_cast %315 : vector<16xf32> to vector<1x1x1x16xf32>
    tpu.vector_store %arg8[%c1_280, %c1_281, %c3_282, %c0_283], %318 {strides = array<i32>} : memref<2x2x9x16xf32, #tpu.memory_space<vmem>>, vector<1x1x1x16xf32>,
    %cst_284 = arith.constant 0.000000e+00 : f32
    %319 = vector.broadcast %cst_284 : f32 to vector<16x16xf32>
    %320 = arith.select %15, %292, %319 : vector<16x16xi1>, vector<16x16xf32>
    %cst_285 = arith.constant dense<0.000000e+00> : vector<16xf32>
    %321 = vector.multi_reduction <add>, %320, %cst_285 [1] : vector<16x16xf32> to vector<16xf32>
    %c1_286 = arith.constant 1 : index
    %c1_287 = arith.constant 1 : index
    %c4_288 = arith.constant 4 : index
    %c0_289 = arith.constant 0 : index
    %322 = vector.load %arg8[%c1_286, %c1_287, %c4_288, %c0_289] : memref<2x2x9x16xf32, #tpu.memory_space<vmem>>, vector<1x1x1x16xf32>
    %323 = vector.shape_cast %322 : vector<1x1x1x16xf32> to vector<16xf32>
    %324 = vector.shape_cast %321 : vector<16xf32> to vector<1x1x1x16xf32>
    tpu.vector_store %arg8[%c1_286, %c1_287, %c4_288, %c0_289], %324 {strides = array<i32>} : memref<2x2x9x16xf32, #tpu.memory_space<vmem>>, vector<1x1x1x16xf32>,
    %cst_290 = arith.constant 0.000000e+00 : f32
    %325 = vector.broadcast %cst_290 : f32 to vector<16x16xf32>
    %326 = arith.select %17, %292, %325 : vector<16x16xi1>, vector<16x16xf32>
    %cst_291 = arith.constant dense<0.000000e+00> : vector<16xf32>
    %327 = vector.multi_reduction <add>, %326, %cst_291 [1] : vector<16x16xf32> to vector<16xf32>
    %c1_292 = arith.constant 1 : index
    %c1_293 = arith.constant 1 : index
    %c5_294 = arith.constant 5 : index
    %c0_295 = arith.constant 0 : index
    %328 = vector.load %arg8[%c1_292, %c1_293, %c5_294, %c0_295] : memref<2x2x9x16xf32, #tpu.memory_space<vmem>>, vector<1x1x1x16xf32>
    %329 = vector.shape_cast %328 : vector<1x1x1x16xf32> to vector<16xf32>
    %330 = vector.shape_cast %327 : vector<16xf32> to vector<1x1x1x16xf32>
    tpu.vector_store %arg8[%c1_292, %c1_293, %c5_294, %c0_295], %330 {strides = array<i32>} : memref<2x2x9x16xf32, #tpu.memory_space<vmem>>, vector<1x1x1x16xf32>,
    %cst_296 = arith.constant 0.000000e+00 : f32
    %331 = vector.broadcast %cst_296 : f32 to vector<16x16xf32>
    %332 = arith.select %19, %292, %331 : vector<16x16xi1>, vector<16x16xf32>
    %cst_297 = arith.constant dense<0.000000e+00> : vector<16xf32>
    %333 = vector.multi_reduction <add>, %332, %cst_297 [1] : vector<16x16xf32> to vector<16xf32>
    %c1_298 = arith.constant 1 : index
    %c1_299 = arith.constant 1 : index
    %c6_300 = arith.constant 6 : index
    %c0_301 = arith.constant 0 : index
    %334 = vector.load %arg8[%c1_298, %c1_299, %c6_300, %c0_301] : memref<2x2x9x16xf32, #tpu.memory_space<vmem>>, vector<1x1x1x16xf32>
    %335 = vector.shape_cast %334 : vector<1x1x1x16xf32> to vector<16xf32>
    %336 = vector.shape_cast %333 : vector<16xf32> to vector<1x1x1x16xf32>
    tpu.vector_store %arg8[%c1_298, %c1_299, %c6_300, %c0_301], %336 {strides = array<i32>} : memref<2x2x9x16xf32, #tpu.memory_space<vmem>>, vector<1x1x1x16xf32>,
    %cst_302 = arith.constant 0.000000e+00 : f32
    %337 = vector.broadcast %cst_302 : f32 to vector<16x16xf32>
    %338 = arith.select %21, %292, %337 : vector<16x16xi1>, vector<16x16xf32>
    %cst_303 = arith.constant dense<0.000000e+00> : vector<16xf32>
    %339 = vector.multi_reduction <add>, %338, %cst_303 [1] : vector<16x16xf32> to vector<16xf32>
    %c1_304 = arith.constant 1 : index
    %c1_305 = arith.constant 1 : index
    %c7_306 = arith.constant 7 : index
    %c0_307 = arith.constant 0 : index
    %340 = vector.load %arg8[%c1_304, %c1_305, %c7_306, %c0_307] : memref<2x2x9x16xf32, #tpu.memory_space<vmem>>, vector<1x1x1x16xf32>
    %341 = vector.shape_cast %340 : vector<1x1x1x16xf32> to vector<16xf32>
    %342 = vector.shape_cast %339 : vector<16xf32> to vector<1x1x1x16xf32>
    tpu.vector_store %arg8[%c1_304, %c1_305, %c7_306, %c0_307], %342 {strides = array<i32>} : memref<2x2x9x16xf32, #tpu.memory_space<vmem>>, vector<1x1x1x16xf32>,
    %cst_308 = arith.constant 0.000000e+00 : f32
    %343 = vector.broadcast %cst_308 : f32 to vector<16x16xf32>
    %344 = arith.select %23, %292, %343 : vector<16x16xi1>, vector<16x16xf32>
    %cst_309 = arith.constant dense<0.000000e+00> : vector<16xf32>
    %345 = vector.multi_reduction <add>, %344, %cst_309 [1] : vector<16x16xf32> to vector<16xf32>
    %c1_310 = arith.constant 1 : index
    %c1_311 = arith.constant 1 : index
    %c8_312 = arith.constant 8 : index
    %c0_313 = arith.constant 0 : index
    %346 = vector.load %arg8[%c1_310, %c1_311, %c8_312, %c0_313] : memref<2x2x9x16xf32, #tpu.memory_space<vmem>>, vector<1x1x1x16xf32>
    %347 = vector.shape_cast %346 : vector<1x1x1x16xf32> to vector<16xf32>
    %348 = vector.shape_cast %345 : vector<16xf32> to vector<1x1x1x16xf32>
    tpu.vector_store %arg8[%c1_310, %c1_311, %c8_312, %c0_313], %348 {strides = array<i32>} : memref<2x2x9x16xf32, #tpu.memory_space<vmem>>, vector<1x1x1x16xf32>,
    %c1_314 = arith.constant 1 : index
    %c0_315 = arith.constant 0 : index
    %c0_316 = arith.constant 0 : index
    %349 = vector.load %arg9[%c1_314, %c0_315, %c0_316] : memref<2x16x4xf32, #tpu.memory_space<vmem>>, vector<1x16x4xf32>
    %350 = vector.shape_cast %349 : vector<1x16x4xf32> to vector<16x4xf32>
    %351 = vector.shape_cast %294 : vector<16x4xf32> to vector<1x16x4xf32>
    tpu.vector_store %arg9[%c1_314, %c0_315, %c0_316], %351 {strides = array<i32>} : memref<2x16x4xf32, #tpu.memory_space<vmem>>, vector<1x16x4xf32>,
    return
  }
  func.func @transform_0(%arg0: i32) -> (i32, i32, i32) {
    %c0_i32 = arith.constant 0 : i32
    %c0_i32_0 = arith.constant 0 : i32
    %c0_i32_1 = arith.constant 0 : i32
    %c0_i32_2 = arith.constant 0 : i32
    return %c0_i32, %c0_i32_0, %c0_i32_1 : i32, i32, i32
  }
  func.func @transform_1(%arg0: i32) -> (i32, i32, i32) {
    %c0_i32 = arith.constant 0 : i32
    %c0_i32_0 = arith.constant 0 : i32
    %c0_i32_1 = arith.constant 0 : i32
    %c0_i32_2 = arith.constant 0 : i32
    return %c0_i32, %c0_i32_0, %c0_i32_1 : i32, i32, i32
  }
  func.func @transform_2(%arg0: i32) -> (i32, i32, i32) {
    %c0_i32 = arith.constant 0 : i32
    %c0_i32_0 = arith.constant 0 : i32
    %c0_i32_1 = arith.constant 0 : i32
    %c0_i32_2 = arith.constant 0 : i32
    return %c0_i32, %c0_i32_0, %c0_i32_1 : i32, i32, i32
  }
  func.func @transform_3(%arg0: i32) -> (i32, i32, i32) {
    %c0_i32 = arith.constant 0 : i32
    %c0_i32_0 = arith.constant 0 : i32
    %c0_i32_1 = arith.constant 0 : i32
    %c0_i32_2 = arith.constant 0 : i32
    return %c0_i32, %c0_i32_0, %c0_i32_1 : i32, i32, i32
  }
  func.func @transform_4(%arg0: i32) -> (i32, i32, i32) {
    %c0_i32 = arith.constant 0 : i32
    %c0_i32_0 = arith.constant 0 : i32
    %c0_i32_1 = arith.constant 0 : i32
    %c0_i32_2 = arith.constant 0 : i32
    return %c0_i32, %c0_i32_0, %c0_i32_1 : i32, i32, i32
  }
  func.func @transform_5(%arg0: i32) -> (i32, i32, i32) {
    %c0_i32 = arith.constant 0 : i32
    %c0_i32_0 = arith.constant 0 : i32
    %c0_i32_1 = arith.constant 0 : i32
    %c0_i32_2 = arith.constant 0 : i32
    return %c0_i32, %c0_i32_0, %c0_i32_1 : i32, i32, i32
  }
  func.func @transform_6(%arg0: i32) -> (i32, i32, i32) {
    %c0_i32 = arith.constant 0 : i32
    %c0_i32_0 = arith.constant 0 : i32
    %c0_i32_1 = arith.constant 0 : i32
    %c0_i32_2 = arith.constant 0 : i32
    return %c0_i32, %c0_i32_0, %c0_i32_1 : i32, i32, i32
  }
  func.func @transform_7(%arg0: i32) -> (i32, i32, i32, i32) {
    %c0_i32 = arith.constant 0 : i32
    %c0_i32_0 = arith.constant 0 : i32
    %c0_i32_1 = arith.constant 0 : i32
    %c0_i32_2 = arith.constant 0 : i32
    %c0_i32_3 = arith.constant 0 : i32
    return %c0_i32, %c0_i32_0, %c0_i32_1, %c0_i32_2 : i32, i32, i32, i32
  }
  func.func @transform_8(%arg0: i32) -> (i32, i32, i32) {
    %c0_i32 = arith.constant 0 : i32
    %c0_i32_0 = arith.constant 0 : i32
    %c0_i32_1 = arith.constant 0 : i32
    %c0_i32_2 = arith.constant 0 : i32
    return %c0_i32, %c0_i32_0, %c0_i32_1 : i32, i32, i32
  }
}

</mosaic_0001>

<bundles_post_ra>
// kernel: model_forward.1
= control target key start
LH: loop header
LB: loop body
LE: loop exit
PB: predicated region body
PF: predicated region fallthrough
CT: control target
= control target key end

     0   :  { %vm74_vm0 = vcmask 1043456   ;;  %vm67_vm1 = vcmask 97280   ;;  %vm163_vm2 = vcmask 64512   ;;  %v28_v49 = vlaneseq  ;;  %s2336_s2 = inlined_call_operand.vmem [shape: f32[2,12,8], index: 2, kind: input, shape index: {}]   ;;  %s2337_s0 = inlined_call_operand.vmem [shape: f32[2,16,12], index: 0, kind: input, shape index: {}]   ;;  %s2338_s1 = inlined_call_operand.vmem [shape: f32[2,12,8], index: 1, kind: input, shape index: {}]   ;;  %s2339_s6 = inlined_call_operand.vmem [shape: f32[2,1,4], index: 6, kind: input, shape index: {}]   ;;  %s2340_s3 = inlined_call_operand.vmem [shape: f32[2,12,4], index: 3, kind: input, shape index: {}]   ;;  %s2341_s5 = inlined_call_operand.vmem [shape: f32[2,16,8], index: 5, kind: input, shape index: {}]   ;;  %s2342_s4 = inlined_call_operand.vmem [shape: f32[2,16,8], index: 4, kind: input, shape index: {}]   ;;  %s2343_s8 = inlined_call_operand.vmem [shape: f32[2,16,4], index: 8, kind: output, shape index: {1}]   ;;  %s2344_s7 = inlined_call_operand.vmem [shape: f32[2,2,9,16], index: 7, kind: output, shape index: {0}]  }
   0x1   :  { %v102_v0 = vld [vmem:[%s2336_s2 + $0x8] sm:$0xf]  ;;  %v1472_v1 = vld [vmem:[%s2336_s2] sm:$0xff]  ;;  %v1309_v4 = vld [vmem:[%s2336_s2 + $0x18] sm:$0xf]  ;;  %vm205_vm7 = vcmask 130048  }
   0x2   :  { %1291 = vmatpush.msk.msra.mxu1 %vm74_vm0, %v102_v0  ;;  %v61_v2 = vld [vmem:[%s2337_s0] sm:$0xff]  ;;  %v64_v3 = vld [vmem:[%s2338_s1 + $0x8] sm:$0xf]  ;;  %v1302_v6 = vld [vmem:[%s2338_s1 + $0x18] sm:$0xf]  ;;  %v29_v51 = vshrl.u32 %v28_v49, 7 }
   0x3   :  { %1288 = vmatpush.msk.msra.mxu0 %vm74_vm0, %v64_v3  ;;  %v63_v5 = vld [vmem:[%s2338_s1] sm:$0xff]  ;;  %v1496_v7 = vld [vmem:[%s2336_s2 + $0x10] sm:$0xff]  ;;  %v62_v9 = vld [vmem:[%s2337_s0 + $0x8] sm:$0xff]  ;;  %v1645_v52 = vand.u32 127, %v28_v49 }
   0x4   :  { %123 = vmatpush.msra.mxu1 %v1472_v1  ;;  %v1503_v8 = vld [vmem:[%s2338_s1 + $0x10] sm:$0xff]  ;;  %v132_v10 = vld [vmem:[%s2340_s3 + $0x8] sm:$0xf]  ;;  %v1524_v11 = vld [vmem:[%s2340_s3] sm:$0xff]  ;;  %v30_v58 = vadd.s32 8, %v29_v51 }
   0x5   :  { %1292 = vmatmul.msk.f32.vlgmr.msra.gmra.mxu1 %vm67_vm1, %v61_v2  ;;  %93 = vmatpush.msra.mxu0 %v63_v5  ;;  %v1316_v12 = vld [vmem:[%s2340_s3 + $0x18] sm:$0xf]  ;;  %v1536_v13 = vld [vmem:[%s2340_s3 + $0x10] sm:$0xff]  ;;  %v1544_v16 = vld [vmem:[%s2341_s5 + $0x8] sm:$0xff]  ;;  %v1651_v54 = vsub.s32 %v1645_v52, %v29_v51 }
   0x6   :  { %1312 = vmatpush.msk.msrb.mxu1 %vm74_vm0, %v1309_v4  ;;  %1289 = vmatmul.msk.f32.vlgmr.msra.gmra.mxu0 %vm67_vm1, %v61_v2  ;;  %v1550_v19 = vld [vmem:[%s2341_s5] sm:$0xff]  ;;  %v680_v25 = vld [vmem:[%s2338_s1 + $0x8] sm:$0xf]  ;;  %v1574_v27 = vld [vmem:[%s2337_s0 + $0x10] sm:$0xff]  ;;  %v1656_v60 = vsub.s32 %v1645_v52, %v30_v58 }
   0x7   :  { %1305 = vmatpush.msk.msrb.mxu0 %vm74_vm0, %v1302_v6  ;;  %1294 = vmatpush.msk.msra.mxu2 %vm74_vm0, %v132_v10  ;;  %v1556_v20 = vld [vmem:[%s2342_s4] sm:$0xff]  ;;  %v1568_v26 = vld [vmem:[%s2342_s4 + $0x8] sm:$0xff]  ;;  %v1580_v29 = vld [vmem:[%s2341_s5 + $0x18] sm:$0xff]  ;;  %v36_v59 = vsub.s32 0, %v1651_v54  ;;  %vm35_vm3 = vcmp.lt.s32.totalorder %v1651_v54, 0  ;;  %vm47_vm8 = vcmp.eq.s32.totalorder %v1651_v54, 4294967294 }
   0x8   :  { %398 = vmatpush.msrb.mxu1 %v1496_v7  ;;  %v1588_v33 = vld [vmem:[%s2341_s5 + $0x10] sm:$0xff]  ;;  %v716_v36 = vld [vmem:[%s2336_s2 + $0x8] sm:$0xf]  ;;  %v1604_v37 = vld [vmem:[%s2337_s0 + $0x18] sm:$0xff]  ;;  %v39_v62 = vsub.s32 0, %v1656_v60  ;;  %vm38_vm5 = vcmp.lt.s32.totalorder %v1656_v60, 0 }
   0x9   :  { %366 = vmatpush.msrb.mxu0 %v1503_v8  ;;  %155 = vmatpush.msra.mxu2 %v1524_v11  ;;  %v1595_v34 = vld [vmem:[%s2342_s4 + $0x10] sm:$0xff]  ;;  %v1370_v39 = vld [vmem:[%s2336_s2 + $0x18] sm:$0xf]  ;;  %v1401_v45 = vld [vmem:[%s2339_s6] ss:$0 sm:$0xff]  ;;  %v1659_v61 = vsel %vm35_vm3, %v36_v59, %v1651_v54  ;;  %vm45_vm9 = vcmp.eq.s32.totalorder %v1651_v54, 4294967293 }
   0xa   :  { %1295 = vmatmul.msk.f32.vlgmr.msra.gmra.mxu2 %vm67_vm1, %v61_v2  ;;  %v1618_v40 = vld [vmem:[%s2342_s4 + $0x18] sm:$0xff]  ;;  %v1402_v53 = vld [vmem:[%s2339_s6 + $0x1] ss:$0 sm:$0xff]  ;;  %vm2346_vm4 = vcmp.le.s32.totalorder %v1659_v61, 4  ;;  %vm43_vm10 = vcmp.eq.s32.totalorder %v1651_v54, 4294967292  ;;  %vm51_vm11 = vcmp.eq.s32.totalorder %v1651_v54, 0 }
   0xb   :  { %1318 = vmatpush.msk.msrb.mxu2 %vm74_vm0, %v1316_v12  ;;  %v1363_v43 = vld [vmem:[%s2338_s1 + $0x18] sm:$0xf]  ;;  %vm53_vm12 = vcmp.eq.s32.totalorder %v1651_v54, 1  ;;  %vm49_vm13 = vcmp.eq.s32.totalorder %v1651_v54, 4294967295  ;;  %vm57_vm14 = vcmp.eq.s32.totalorder %v1651_v54, 3  ;;  %vm2355_vm15 = vcmp.eq.s32.totalorder %v1651_v54, 4 }
   0xc   :  { %vm2352_vm3 = vcmp.eq.s32.totalorder %v1651_v54, 2 }
   0xd   :  { %1293 = vmatmul.msk.f32.gmra.mxu1 %vm67_vm1, %v62_v9  ;;  %432 = vmatpush.msrb.mxu2 %v1536_v13 }
   0xe   :  { %1290 = vmatmul.msk.f32.gmra.mxu0 %vm67_vm1, %v62_v9 }
   0xf   :  { %1340 = vmatpush.msk.msra.mxu2 %vm74_vm0, %v680_v25 }
  0x11   :  { %707 = vmatpush.msra.mxu2 %v63_v5 }
  0x12   :  { %1296 = vmatmul.msk.f32.gmra.mxu2 %vm67_vm1, %v62_v9 }
  0x15   :  { %1313 = vmatmul.msk.f32.vlgmr.msrb.gmra.mxu1 %vm67_vm1, %v61_v2 }
  0x16   :  { %1306 = vmatmul.msk.f32.vlgmr.msrb.gmra.mxu0 %vm67_vm1, %v61_v2 }
  0x1a   :  { %1319 = vmatmul.msk.f32.vlgmr.msrb.gmra.mxu2 %vm67_vm1, %v61_v2 }
  0x1b   :  { %1366 = vmatpush.msk.msrb.mxu2 %vm74_vm0, %v1363_v43 }
  0x1d   :  { %1314 = vmatmul.msk.f32.gmra.mxu1 %vm67_vm1, %v62_v9  ;;  %974 = vmatpush.msrb.mxu2 %v1503_v8  ;;  %v746_v8 = vld [vmem:[%s2340_s3 + $0x8] sm:$0xf] }
  0x1e   :  { %1307 = vmatmul.msk.f32.gmra.mxu0 %vm67_vm1, %v62_v9 }
  0x22   :  { %1320 = vmatmul.msk.f32.gmra.mxu2 %vm67_vm1, %v62_v9 }
  0x2a   :  { %1341 = vmatmul.msk.f32.vlgmr.msra.gmra.mxu2 %vm67_vm1, %v1574_v27 }
  0x32   :  { %1342 = vmatmul.msk.f32.gmra.mxu2 %vm67_vm1, %v1604_v37 }
  0x3a   :  { %1367 = vmatmul.msk.f32.vlgmr.msrb.gmra.mxu2 %vm67_vm1, %v1574_v27 }
  0x42   :  { %1368 = vmatmul.msk.f32.gmra.mxu2 %vm67_vm1, %v1604_v37 }
  0x82   :  { %v125_v14 = vpop.f32.mrf.mxu1 }
  0x83   :  { %v95_v15 = vpop.f32.mrf.mxu0  ;;  %v126_v21 = vadd.f32 %v125_v14, %v1550_v19 }
  0x84   :  { %v96_v22 = vadd.f32 %v95_v15, %v1556_v20 }
  0x8a   :  { %v128_v17 = vpop.f32.mrf.mxu1 }
  0x8b   :  { %v129_v18 = vadd.f32 %v128_v17, %v1544_v16  ;;  %v98_v23 = vpop.f32.mrf.mxu0 }
  0x8c   :  { %v99_v28 = vadd.f32 %v98_v23, %v1568_v26 }
  0x8d   :  { %1297 = vmatpush.xpose.msk.msra.mxu3 %vm163_vm2, %v129_v18  ;;  %v157_v44 = vpop.f32.mrf.mxu2 }
  0x8e   :  { %v158_v47 = vadd.f32 %v1401_v45, %v157_v44 }
  0x91   :  { %1298 = vmatpush.xpose.msk.msra.mxu3 %vm163_vm2, %v126_v21 }
  0x92   :  { %v400_v24 = vpop.f32.mrf.mxu1 }
  0x93   :  { %v368_v32 = vpop.f32.mrf.mxu0  ;;  %v401_v35 = vadd.f32 %v1588_v33, %v400_v24 }
  0x94   :  { %1299 = vmatmul.msk.f32.vlgmr.msra.gmra.mxu3 %vm163_vm2, %v96_v22  ;;  %v369_v38 = vadd.f32 %v1595_v34, %v368_v32 }
  0x95   :  { %v160_v46 = vpop.f32.mrf.mxu2 }
  0x96   :  { %v161_v48 = vadd.f32 %v1401_v45, %v160_v46 }
  0x98   :  { %528 = vmatpush.msra.mxu1 %v161_v48 }
  0x9a   :  { %v403_v30 = vpop.f32.mrf.mxu1  ;;  %529 = vmatpush.msra.mxu1 %v158_v47 }
  0x9b   :  { %v404_v31 = vadd.f32 %v1580_v29, %v403_v30  ;;  %v371_v41 = vpop.f32.mrf.mxu0 }
  0x9c   :  { %1300 = vmatmul.msk.f32.gmra.mxu3 %vm163_vm2, %v99_v28  ;;  %v372_v42 = vadd.f32 %v1618_v40, %v371_v41 }
  0x9d   :  { %1321 = vmatpush.xpose.msk.msrb.mxu3 %vm163_vm2, %v404_v31  ;;  %v434_v50 = vpop.f32.mrf.mxu2 }
  0x9e   :  { %v435_v56 = vadd.f32 %v1402_v53, %v434_v50 }
  0xa1   :  { %1322 = vmatpush.xpose.msk.msrb.mxu3 %vm163_vm2, %v401_v35 }
  0xa4   :  { %1323 = vmatmul.msk.f32.vlgmr.msrb.gmra.mxu3 %vm163_vm2, %v369_v38 }
  0xa5   :  { %1343 = vmatpush.msk.msra.mxu3 %vm74_vm0, %v716_v36  ;;  %v437_v55 = vpop.f32.mrf.mxu2 }
  0xa6   :  { %v438_v57 = vadd.f32 %v1402_v53, %v437_v55 }
  0xa7   :  { %737 = vmatpush.msra.mxu3 %v1472_v1  ;;  %v1667_v1 = vsel %vm38_vm5, %v39_v62, %v1656_v60  ;;  %vm2348_vm5 = vcmp.eq.s32.totalorder %v1656_v60, 4294967294 }
  0xa8   :  { %499 = vmatpush.msra.mxu0 %v438_v57  ;;  %vm2345_vm6 = vcmp.le.s32.totalorder %v1667_v1, 4 }
  0xa9   :  { %1373 = vmatpush.msk.msrb.mxu3 %vm74_vm0, %v1370_v39  ;;  %v1377_v39 = vld [vmem:[%s2340_s3 + $0x18] sm:$0xf] }
  0xaa   :  { %500 = vmatpush.msra.mxu0 %v435_v56 }
  0xab   :  { %1004 = vmatpush.msrb.mxu3 %v1496_v7 }
  0xac   :  { %1324 = vmatmul.msk.f32.gmra.mxu3 %vm163_vm2, %v372_v42  ;;  %1346 = vmatpush.msk.msrb.mxu0 %vm74_vm0, %v746_v8 }
  0xad   :  { %v709_v49 = vpop.f32.mrf.mxu2 }
  0xae   :  { %769 = vmatpush.msrb.mxu0 %v1524_v11 }
  0xb4   :  { %1344 = vmatmul.msk.f32.vlgmr.msra.gmra.mxu3 %vm67_vm1, %v1574_v27 }
  0xbc   :  { %1345 = vmatmul.msk.f32.gmra.mxu3 %vm67_vm1, %v1604_v37 }
  0xc4   :  { %1374 = vmatmul.msk.f32.vlgmr.msrb.gmra.mxu3 %vm67_vm1, %v1574_v27 }
  0xcc   :  { %1375 = vmatmul.msk.f32.gmra.mxu3 %vm67_vm1, %v1604_v37 }
 0x117   :  { %v193_v63 = vpop.f32.mrf.mxu3 }
 0x118   :  { %v199_v0 = vsel %vm2346_vm4, %v193_v63, 0.0 }
 0x119   :  { %1405 = vtanh.f32 %v199_v0  ;;  %v712_v0 = vpop.f32.mrf.mxu2 }
 0x11f   :  { %v1406_v2 = vpop.eup %1405  ;;  %v196_v3 = vpop.f32.mrf.mxu3 }
 0x120   :  { %v200_v4 = vsel %vm2345_vm6, %v196_v3, 0.0  ;;  %1327 = vmatmul.msk.f32.vlgmr.msra.gmra.mxu1 %vm205_vm7, %v1406_v2  ;;  %v237_v5 = vsel %vm47_vm8, %v1406_v2, 0.0  ;;  %v222_v6 = vsel %vm45_vm9, %v1406_v2, 0.0  ;;  %v203_v7 = vsel %vm43_vm10, %v1406_v2, 0.0 }
 0x121   :  { %1407 = vtanh.f32 %v200_v4  ;;  %v239_v9 = vsel %vm205_vm7, %v237_v5, 0.0  ;;  %v224_v10 = vsel %vm205_vm7, %v222_v6, 0.0  ;;  %v206_v12 = vsel %vm205_vm7, %v203_v7, 0.0 }
 0x122   :  { %240 = vadd.xlane.f32.xlu2 %v239_v9  ;;  %225 = vadd.xlane.f32.xlu1 %v224_v10  ;;  %v267_v14 = vsel %vm51_vm11, %v1406_v2, 0.0  ;;  %v282_v15 = vsel %vm53_vm12, %v1406_v2, 0.0  ;;  %v252_v21 = vsel %vm49_vm13, %v1406_v2, 0.0  ;;  %v312_v25 = vsel %vm57_vm14, %v1406_v2, 0.0 }
 0x123   :  { %207 = vadd.xlane.f32.xlu0 %v206_v12  ;;  %v269_v11 = vsel %vm205_vm7, %v267_v14, 0.0  ;;  %v284_v23 = vsel %vm205_vm7, %v282_v15, 0.0  ;;  %v254_v24 = vsel %vm205_vm7, %v252_v21, 0.0  ;;  %v327_v28 = vsel %vm2355_vm15, %v1406_v2, 0.0  ;;  %v976_v14 = vpop.f32.mrf.mxu2 }
 0x124   :  { %v297_v32 = vsel %vm2352_vm3, %v1406_v2, 0.0  ;;  %v314_v36 = vsel %vm205_vm7, %v312_v25, 0.0  ;;  %v329_v38 = vsel %vm205_vm7, %v327_v28, 0.0  ;;  %v713_v6 = vadd.f32 %v712_v0, %v1568_v26 }
 0x125   :  { %v299_v41 = vsel %vm205_vm7, %v297_v32, 0.0 }
 0x127   :  { %v1697_v17 = vpop.eup %1407  ;;  %v469_v18 = vpop.f32.mrf.mxu3 }
 0x128   :  { %v475_v22 = vsel %vm2346_vm4, %v469_v18, 0.0  ;;  %1328 = vmatmul.msk.f32.gmra.mxu1 %vm205_vm7, %v1697_v17  ;;  %vm44_vm4 = vcmp.eq.s32.totalorder %v1656_v60, 4294967292  ;;  %v238_v42 = vsel %vm2348_vm5, %v1697_v17, 0.0  ;;  %vm2350_vm5 = vcmp.eq.s32.totalorder %v1656_v60, 0 }
 0x129   :  { %1409 = vtanh.f32 %v475_v22  ;;  %v204_v46 = vsel %vm44_vm4, %v1697_v17, 0.0  ;;  %v268_v55 = vsel %vm2350_vm5, %v1697_v17, 0.0  ;;  %vm56_vm5 = vcmp.eq.s32.totalorder %v1656_v60, 2 }
 0x12a   :  { %270 = vadd.xlane.f32.xlu2 %v269_v11  ;;  %285 = vadd.xlane.f32.xlu1 %v284_v23  ;;  %v209_v48 = vsel %vm205_vm7, %v204_v46, 0.0  ;;  %v272_v59 = vsel %vm205_vm7, %v268_v55, 0.0  ;;  %v298_v3 = vsel %vm56_vm5, %v1697_v17, 0.0 }
 0x12b   :  { %255 = vadd.xlane.f32.xlu0 %v254_v24  ;;  %v302_v4 = vsel %vm205_vm7, %v298_v3, 0.0  ;;  %v979_v23 = vpop.f32.mrf.mxu2 }
 0x12c   :  { %v980_v24 = vadd.f32 %v1618_v40, %v979_v23 }
 0x12f   :  { %v1715_v30 = vpop.eup %1409  ;;  %v472_v31 = vpop.f32.mrf.mxu3 }
 0x130   :  { %v476_v35 = vsel %vm2345_vm6, %v472_v31, 0.0  ;;  %1325 = vmatmul.msk.f32.vlgmr.msra.gmra.mxu0 %vm205_vm7, %v1715_v30  ;;  %vm2347_vm6 = vcmp.eq.s32.totalorder %v1656_v60, 4294967293  ;;  %v553_v7 = vsel %vm45_vm9, %v1715_v30, 0.0  ;;  %v568_v9 = vsel %vm47_vm8, %v1715_v30, 0.0 }
 0x131   :  { %1411 = vtanh.f32 %v476_v35  ;;  %1379 = vmatpush.msk.msra.mxu0 %vm74_vm0, %v1377_v39  ;;  %v223_v43 = vsel %vm2347_vm6, %v1697_v17, 0.0  ;;  %vm2351_vm0 = vcmp.eq.s32.totalorder %v1656_v60, 1  ;;  %vm2349_vm6 = vcmp.eq.s32.totalorder %v1656_v60, 4294967295 }
 0x132   :  { %315 = vadd.xlane.f32.xlu2 %v314_v36  ;;  %330 = vadd.xlane.f32.xlu1 %v329_v38  ;;  %v227_v47 = vsel %vm205_vm7, %v223_v43, 0.0  ;;  %v283_v50 = vsel %vm2351_vm0, %v1697_v17, 0.0  ;;  %v253_v53 = vsel %vm2349_vm6, %v1697_v17, 0.0  ;;  %vm60_vm6 = vcmp.eq.s32.totalorder %v1656_v60, 4 }
 0x133   :  { %300 = vadd.xlane.f32.xlu0 %v299_v41  ;;  %1036 = vmatpush.msra.mxu0 %v1536_v13  ;;  %v242_v13 = vsel %vm205_vm7, %v238_v42, 0.0  ;;  %v287_v57 = vsel %vm205_vm7, %v283_v50, 0.0  ;;  %v257_v58 = vsel %vm205_vm7, %v253_v53, 0.0  ;;  %vm2354_vm0 = vcmp.eq.s32.totalorder %v1656_v60, 3 }
 0x134   :  { %v328_v63 = vsel %vm60_vm6, %v1697_v17, 0.0  ;;  %v537_v10 = vsel %vm43_vm10, %v1715_v30, 0.0  ;;  %v555_v26 = vsel %vm205_vm7, %v553_v7, 0.0  ;;  %v583_v21 = vsel %vm49_vm13, %v1715_v30, 0.0 }
 0x135   :  { %v539_v18 = vsel %vm205_vm7, %v537_v10, 0.0  ;;  %v585_v11 = vsel %vm205_vm7, %v583_v21, 0.0  ;;  %v643_v25 = vsel %vm57_vm14, %v1715_v30, 0.0  ;;  %v628_v28 = vsel %vm2352_vm3, %v1715_v30, 0.0 }
 0x136   :  { %v645_v31 = vsel %vm205_vm7, %v643_v25, 0.0  ;;  %v630_v40 = vsel %vm205_vm7, %v628_v28, 0.0  ;;  %vm2357_vm3 = vcmp.eq.s32.totalorder %v1656_v60, 4294967293 }
 0x137   :  { %v1740_v44 = vpop.eup %1411  ;;  %v739_v45 = vpop.f32.mrf.mxu3 }
 0x138   :  { %1326 = vmatmul.msk.f32.gmra.mxu0 %vm205_vm7, %v1740_v44  ;;  %v740_v62 = vadd.f32 %v739_v45, %v1550_v19  ;;  %v313_v19 = vsel %vm2354_vm0, %v1697_v17, 0.0  ;;  %v570_v17 = vsel %vm205_vm7, %v568_v9, 0.0  ;;  %v538_v36 = vsel %vm44_vm4, %v1740_v44, 0.0 }
 0x139   :  { %v317_v5 = vsel %vm205_vm7, %v313_v19, 0.0  ;;  %v542_v39 = vsel %vm205_vm7, %v538_v36, 0.0  ;;  %v644_v50 = vsel %vm2354_vm0, %v1740_v44, 0.0  ;;  %vm2362_vm0 = vcmp.le.s32.totalorder %v1667_v1, 4 }
 0x13a   :  { %243 = vadd.xlane.f32.xlu2 %v242_v13  ;;  %228 = vadd.xlane.f32.xlu1 %v227_v47  ;;  %v648_v55 = vsel %vm205_vm7, %v644_v50, 0.0 }
 0x13b   :  { %210 = vadd.xlane.f32.xlu0 %v209_v48  ;;  %v659_v48 = vsel %vm60_vm6, %v1740_v44, 0.0 }
 0x13f   :  { %v742_v51 = vpop.f32.mrf.mxu3 }
 0x140   :  { %v743_v56 = vadd.f32 %v742_v51, %v1544_v16  ;;  %1347 = vmatmul.msk.f32.vlgmr.msrb.gmra.mxu0 %vm67_vm1, %v1574_v27  ;;  %v710_v16 = vadd.f32 %v709_v49, %v1556_v20  ;;  %v332_v20 = vsel %vm205_vm7, %v328_v63, 0.0  ;;  %v629_v49 = vsel %vm56_vm5, %v1740_v44, 0.0 }
 0x141   :  { %v663_v51 = vsel %vm205_vm7, %v659_v48, 0.0  ;;  %v633_v53 = vsel %vm205_vm7, %v629_v49, 0.0  ;;  %v1403_v48 = vld [vmem:[%s2339_s6] ss:$0 sm:$0xff] }
 0x142   :  { %1349 = vmatpush.xpose.msk.msrb.mxu1 %vm163_vm2, %v743_v56  ;;  %288 = vadd.xlane.f32.xlu2 %v287_v57 }
 0x143   :  { %258 = vadd.xlane.f32.xlu1 %v257_v58  ;;  %273 = vadd.xlane.f32.xlu0 %v272_v59 }
 0x146   :  { %1350 = vmatpush.xpose.msk.msrb.mxu1 %vm163_vm2, %v740_v62 }
 0x147   :  { %v1006_v2 = vpop.f32.mrf.mxu3 }
 0x148   :  { %1348 = vmatmul.msk.f32.gmra.mxu0 %vm67_vm1, %v1604_v37  ;;  %v1007_v15 = vadd.f32 %v1588_v33, %v1006_v2  ;;  %v613_v33 = vsel %vm53_vm12, %v1715_v30, 0.0 }
 0x149   :  { %1351 = vmatmul.msk.f32.vlgmr.msrb.gmra.mxu1 %vm163_vm2, %v710_v16  ;;  %v615_v22 = vsel %vm205_vm7, %v613_v33, 0.0 }
 0x14a   :  { %333 = vadd.xlane.f32.xlu2 %v332_v20 }
 0x14b   :  { %303 = vadd.xlane.f32.xlu1 %v302_v4  ;;  %318 = vadd.xlane.f32.xlu0 %v317_v5 }
 0x14f   :  { %v1009_v8 = vpop.f32.mrf.mxu3 }
 0x150   :  { %v1010_v12 = vadd.f32 %v1580_v29, %v1009_v8  ;;  %1380 = vmatmul.msk.f32.vlgmr.msra.gmra.mxu0 %vm67_vm1, %v1574_v27  ;;  %v977_v29 = vadd.f32 %v1595_v34, %v976_v14  ;;  %v598_v27 = vsel %vm51_vm11, %v1715_v30, 0.0 }
 0x151   :  { %1352 = vmatmul.msk.f32.gmra.mxu1 %vm163_vm2, %v713_v6  ;;  %v600_v34 = vsel %vm205_vm7, %v598_v27, 0.0 }
 0x152   :  { %1382 = vmatpush.xpose.msk.msra.mxu1 %vm163_vm2, %v1010_v12  ;;  %556 = vadd.xlane.f32.xlu2 %v555_v26 }
 0x153   :  { %571 = vadd.xlane.f32.xlu1 %v570_v17  ;;  %540 = vadd.xlane.f32.xlu0 %v539_v18 }
 0x156   :  { %1383 = vmatpush.xpose.msk.msra.mxu1 %vm163_vm2, %v1007_v15 }
 0x158   :  { %1381 = vmatmul.msk.f32.gmra.mxu0 %vm67_vm1, %v1604_v37  ;;  %v658_v37 = vsel %vm2355_vm15, %v1715_v30, 0.0  ;;  %vm2356_vm1 = vcmp.eq.s32.totalorder %v1656_v60, 4294967294  ;;  %v554_v30 = vsel %vm2357_vm3, %v1740_v44, 0.0  ;;  %vm2360_vm3 = vcmp.eq.s32.totalorder %v1656_v60, 0 }
 0x159   :  { %1384 = vmatmul.msk.f32.vlgmr.msra.gmra.mxu1 %vm163_vm2, %v977_v29  ;;  %v660_v32 = vsel %vm205_vm7, %v658_v37, 0.0  ;;  %v569_v35 = vsel %vm2356_vm1, %v1740_v44, 0.0  ;;  %v558_v41 = vsel %vm205_vm7, %v554_v30, 0.0  ;;  %vm2359_vm1 = vcmp.eq.s32.totalorder %v1656_v60, 4294967295 }
 0x15a   :  { %601 = vadd.xlane.f32.xlu2 %v600_v34  ;;  %v573_v38 = vsel %vm205_vm7, %v569_v35, 0.0  ;;  %v584_v43 = vsel %vm2359_vm1, %v1740_v44, 0.0  ;;  %v599_v45 = vsel %vm2360_vm3, %v1740_v44, 0.0  ;;  %vm217_vm1 = vcmask 130112  }
 0x15b   :  { %616 = vadd.xlane.f32.xlu1 %v615_v22  ;;  %586 = vadd.xlane.f32.xlu0 %v585_v11  ;;  %v588_v13 = vsel %vm205_vm7, %v584_v43, 0.0  ;;  %v603_v47 = vsel %vm205_vm7, %v599_v45, 0.0  ;;  %vm220_vm3 = vcmask 122880  }
 0x161   :  { %1385 = vmatmul.msk.f32.gmra.mxu1 %vm163_vm2, %v980_v24  ;;  %vm2358_vm2 = vcmp.eq.s32.totalorder %v1656_v60, 1 }
 0x162   :  { %646 = vadd.xlane.f32.xlu2 %v645_v31  ;;  %v614_v42 = vsel %vm2358_vm2, %v1740_v44, 0.0  ;;  %v1877_v44 = vadd.s32 4294967288, %v1645_v52  ;;  %vm2353_vm2 = vcmask 31744  }
 0x163   :  { %661 = vadd.xlane.f32.xlu1 %v660_v32  ;;  %631 = vadd.xlane.f32.xlu0 %v630_v40  ;;  %v618_v46 = vsel %vm205_vm7, %v614_v42, 0.0 }
 0x16a   :  { %574 = vadd.xlane.f32.xlu2 %v573_v38 }
 0x16b   :  { %543 = vadd.xlane.f32.xlu1 %v542_v39  ;;  %559 = vadd.xlane.f32.xlu0 %v558_v41 }
 0x172   :  { %619 = vadd.xlane.f32.xlu2 %v618_v46 }
 0x173   :  { %589 = vadd.xlane.f32.xlu1 %v588_v13  ;;  %604 = vadd.xlane.f32.xlu0 %v603_v47 }
 0x17a   :  { %664 = vadd.xlane.f32.xlu2 %v663_v51 }
 0x17b   :  { %634 = vadd.xlane.f32.xlu1 %v633_v53  ;;  %649 = vadd.xlane.f32.xlu0 %v648_v55 }
 0x195   :  { %v241_v56 = vpop.xlane.xlu2 %240  ;;  %v226_v57 = vpop.xlane.xlu1 %225 }
 0x196   :  { %v208_v58 = vpop.xlane.xlu0 %207  ;;  %v247_v4 = vperm.slane %v241_v56, %v1645_v52  ;;  %v232_v9 = vperm.slane %v226_v57, %v1645_v52 }
 0x197   :  { %v214_v10 = vperm.slane %v208_v58, %v1645_v52 }
 0x19d   :  { %v271_v59 = vpop.xlane.xlu2 %270  ;;  %v286_v62 = vpop.xlane.xlu1 %285 }
 0x19e   :  { %v256_v16 = vpop.xlane.xlu0 %255  ;;  %v531_v3 = vpop.f32.mrf.mxu1  ;;  %v292_v33 = vperm.slane %v286_v62, %v1645_v52  ;;  %v277_v23 = vperm.slane %v271_v59, %v1645_v52 }
 0x19f   :  { %v262_v24 = vperm.slane %v256_v16, %v1645_v52 }
 0x1a5   :  { %v316_v63 = vpop.xlane.xlu2 %315  ;;  %v331_v0 = vpop.xlane.xlu1 %330 }
 0x1a6   :  { %v301_v2 = vpop.xlane.xlu0 %300  ;;  %v534_v18 = vpop.f32.mrf.mxu1  ;;  %v337_v36 = vperm.slane %v331_v0, %v1645_v52  ;;  %v322_v41 = vperm.slane %v316_v63, %v1645_v52 }
 0x1a7   :  { %v307_v42 = vperm.slane %v301_v2, %v1645_v52 }
 0x1ad   :  { %v502_v19 = vpop.f32.mrf.mxu0  ;;  %v244_v20 = vpop.xlane.xlu2 %243 }
 0x1ae   :  { %v532_v5 = vadd.f32 %v531_v3, %v502_v19  ;;  %v248_v6 = vperm.slane %v244_v20, %v1877_v44  ;;  %v229_v7 = vpop.xlane.xlu1 %228  ;;  %v211_v8 = vpop.xlane.xlu0 %210 }
 0x1af   :  { %v233_v12 = vperm.slane %v229_v7, %v1877_v44  ;;  %v216_v14 = vperm.slane %v211_v8, %v1877_v44  ;;  %v1404_v8 = vld [vmem:[%s2339_s6 + $0x1] ss:$0 sm:$0xff] }
 0x1b0   :  { %674 = vst.msk [vmem:[%s2343_s8] sm:$0xff] %vm2353_vm2, %v532_v5  ;;  %v249_v26 = vsel %vm217_vm1, %v248_v6, %v247_v4 }
 0x1b1   :  { %251 = vst.msk [vmem:[%s2344_s7 + $0x2] sm:$0x1] %vm220_vm3, %v249_v26  ;;  %v234_v15 = vsel %vm217_vm1, %v233_v12, %v232_v9  ;;  %v218_v17 = vsel %vm217_vm1, %v216_v14, %v214_v10 }
 0x1b2   :  { %236 = vst.msk [vmem:[%s2344_s7 + $0x1] sm:$0x1] %vm220_vm3, %v234_v15 }
 0x1b3   :  { %221 = vst.msk [vmem:[%s2344_s7] sm:$0x1] %vm220_vm3, %v218_v17 }
 0x1b5   :  { %v505_v29 = vpop.f32.mrf.mxu0  ;;  %v289_v27 = vpop.xlane.xlu2 %288 }
 0x1b6   :  { %v535_v21 = vadd.f32 %v534_v18, %v505_v29  ;;  %v293_v34 = vperm.slane %v289_v27, %v1877_v44  ;;  %v259_v22 = vpop.xlane.xlu1 %258  ;;  %v274_v11 = vpop.xlane.xlu0 %273 }
 0x1b7   :  { %v263_v25 = vperm.slane %v259_v22, %v1877_v44  ;;  %v278_v37 = vperm.slane %v274_v11, %v1877_v44 }
 0x1b8   :  { %675 = vst.msk [vmem:[%s2343_s8 + $0x8] sm:$0xff] %vm2353_vm2, %v535_v21  ;;  %v294_v28 = vsel %vm217_vm1, %v293_v34, %v292_v33  ;;  %vm2361_vm2 = vcmp.le.s32.totalorder %v1659_v61, 4 }
 0x1b9   :  { %296 = vst.msk [vmem:[%s2344_s7 + $0x5] sm:$0x1] %vm220_vm3, %v294_v28  ;;  %v264_v31 = vsel %vm217_vm1, %v263_v25, %v262_v24  ;;  %v279_v32 = vsel %vm217_vm1, %v278_v37, %v277_v23 }
 0x1ba   :  { %266 = vst.msk [vmem:[%s2344_s7 + $0x3] sm:$0x1] %vm220_vm3, %v264_v31 }
 0x1bb   :  { %281 = vst.msk [vmem:[%s2344_s7 + $0x4] sm:$0x1] %vm220_vm3, %v279_v32 }
 0x1bd   :  { %v334_v40 = vpop.xlane.xlu2 %333  ;;  %v771_v35 = vpop.f32.mrf.mxu0 }
 0x1be   :  { %v338_v30 = vperm.slane %v334_v40, %v1877_v44  ;;  %v304_v38 = vpop.xlane.xlu1 %303  ;;  %v319_v39 = vpop.xlane.xlu0 %318  ;;  %v772_v51 = vadd.f32 %v1403_v48, %v771_v35 }
 0x1bf   :  { %v308_v43 = vperm.slane %v304_v38, %v1877_v44  ;;  %v323_v45 = vperm.slane %v319_v39, %v1877_v44 }
 0x1c0   :  { %v339_v46 = vsel %vm217_vm1, %v338_v30, %v337_v36 }
 0x1c1   :  { %341 = vst.msk [vmem:[%s2344_s7 + $0x8] sm:$0x1] %vm220_vm3, %v339_v46  ;;  %v309_v13 = vsel %vm217_vm1, %v308_v43, %v307_v42  ;;  %v324_v47 = vsel %vm217_vm1, %v323_v45, %v322_v41 }
 0x1c2   :  { %311 = vst.msk [vmem:[%s2344_s7 + $0x6] sm:$0x1] %vm220_vm3, %v309_v13 }
 0x1c3   :  { %326 = vst.msk [vmem:[%s2344_s7 + $0x7] sm:$0x1] %vm220_vm3, %v324_v47 }
 0x1c5   :  { %v1953_v49 = vpop.xlane.xlu2 %556  ;;  %v774_v50 = vpop.f32.mrf.mxu0 }
 0x1c6   :  { %v1955_v53 = vpop.xlane.xlu1 %571  ;;  %v1957_v55 = vpop.xlane.xlu0 %540  ;;  %v775_v56 = vadd.f32 %v1403_v48, %v774_v50  ;;  %v563_v24 = vperm.slane %v1953_v49, %v1645_v52 }
 0x1c7   :  { %v806_v57 = vpop.f32.mrf.mxu1  ;;  %v578_v25 = vperm.slane %v1955_v53, %v1645_v52  ;;  %v547_v35 = vperm.slane %v1957_v55, %v1645_v52 }
 0x1c8   :  { %v812_v58 = vsel %vm2361_vm2, %v806_v57, 0.0  ;;  %1132 = vmatpush.msra.mxu3 %v775_v56 }
 0x1c9   :  { %1413 = vtanh.f32 %v812_v58 }
 0x1ca   :  { %1133 = vmatpush.msra.mxu3 %v772_v51 }
 0x1cd   :  { %v1961_v59 = vpop.xlane.xlu2 %601  ;;  %v1038_v62 = vpop.f32.mrf.mxu0 }
 0x1ce   :  { %v1963_v16 = vpop.xlane.xlu1 %616  ;;  %v1965_v63 = vpop.xlane.xlu0 %586  ;;  %v1039_v29 = vadd.f32 %v1404_v8, %v1038_v62  ;;  %v608_v51 = vperm.slane %v1961_v59, %v1645_v52 }
 0x1cf   :  { %v1414_v0 = vpop.eup %1413  ;;  %v809_v2 = vpop.f32.mrf.mxu1  ;;  %v623_v53 = vperm.slane %v1963_v16, %v1645_v52  ;;  %v593_v55 = vperm.slane %v1965_v63, %v1645_v52 }
 0x1d0   :  { %v813_v3 = vsel %vm2362_vm0, %v809_v2, 0.0  ;;  %v832_v19 = vsel %vm45_vm9, %v1414_v0, 0.0  ;;  %v847_v20 = vsel %vm47_vm8, %v1414_v0, 0.0  ;;  %v816_v4 = vsel %vm43_vm10, %v1414_v0, 0.0  ;;  %1388 = vmatmul.msk.f32.vlgmr.msra.gmra.mxu3 %vm205_vm7, %v1414_v0  ;;  %vm2363_vm0 = vmmov %vm2361_vm2 }
 0x1d1   :  { %1415 = vtanh.f32 %v813_v3  ;;  %v834_v5 = vsel %vm205_vm7, %v832_v19, 0.0  ;;  %v849_v6 = vsel %vm205_vm7, %v847_v20, 0.0  ;;  %v818_v7 = vsel %vm205_vm7, %v816_v4, 0.0 }
 0x1d2   :  { %835 = vadd.xlane.f32.xlu2 %v834_v5  ;;  %850 = vadd.xlane.f32.xlu1 %v849_v6  ;;  %v877_v15 = vsel %vm51_vm11, %v1414_v0, 0.0  ;;  %v892_v17 = vsel %vm53_vm12, %v1414_v0, 0.0  ;;  %v862_v33 = vsel %vm49_vm13, %v1414_v0, 0.0  ;;  %v922_v61 = vsel %vm57_vm14, %v1414_v0, 0.0 }
 0x1d3   :  { %819 = vadd.xlane.f32.xlu0 %v818_v7  ;;  %v879_v34 = vsel %vm205_vm7, %v877_v15, 0.0  ;;  %v894_v22 = vsel %vm205_vm7, %v892_v17, 0.0  ;;  %v864_v11 = vsel %vm205_vm7, %v862_v33, 0.0  ;;  %v937_v32 = vsel %vm2355_vm15, %v1414_v0, 0.0 }
 0x1d4   :  { %vm2364_vm2 = vcmp.eq.s32.totalorder %v1651_v54, 2  ;;  %v924_v42 = vsel %vm205_vm7, %v922_v61, 0.0  ;;  %v939_v13 = vsel %vm205_vm7, %v937_v32, 0.0  ;;  %vm2370_vm15 = vcmp.eq.s32.totalorder %v1656_v60, 0 }
 0x1d5   :  { %v1982_v9 = vpop.xlane.xlu2 %646  ;;  %v1041_v10 = vpop.f32.mrf.mxu0  ;;  %v907_v38 = vsel %vm2364_vm2, %v1414_v0, 0.0  ;;  %vm2366_vm2 = vcmp.eq.s32.totalorder %v1656_v60, 4294967294 }
 0x1d6   :  { %v1984_v12 = vpop.xlane.xlu1 %661  ;;  %v1986_v14 = vpop.xlane.xlu0 %631  ;;  %v1042_v26 = vadd.f32 %v1404_v8, %v1041_v10  ;;  %v653_v4 = vperm.slane %v1982_v9, %v1645_v52 }
 0x1d7   :  { %v1992_v18 = vpop.eup %1415  ;;  %v1073_v27 = vpop.f32.mrf.mxu1  ;;  %v668_v6 = vperm.slane %v1984_v12, %v1645_v52  ;;  %v638_v17 = vperm.slane %v1986_v14, %v1645_v52 }
 0x1d8   :  { %v1079_v21 = vsel %vm2363_vm0, %v1073_v27, 0.0  ;;  %1103 = vmatpush.msra.mxu2 %v1042_v26  ;;  %1389 = vmatmul.msk.f32.gmra.mxu3 %vm205_vm7, %v1992_v18  ;;  %vm2365_vm0 = vcmp.le.s32.totalorder %v1667_v1, 4  ;;  %v909_v1 = vsel %vm205_vm7, %v907_v38, 0.0  ;;  %v848_v47 = vsel %vm2366_vm2, %v1992_v18, 0.0 }
 0x1d9   :  { %1417 = vtanh.f32 %v1079_v21  ;;  %v817_v48 = vsel %vm44_vm4, %v1992_v18, 0.0  ;;  %v852_v3 = vsel %vm205_vm7, %v848_v47, 0.0  ;;  %vm2368_vm2 = vcmp.eq.s32.totalorder %v1656_v60, 1 }
 0x1da   :  { %880 = vadd.xlane.f32.xlu2 %v879_v34  ;;  %895 = vadd.xlane.f32.xlu1 %v894_v22  ;;  %v821_v59 = vsel %vm205_vm7, %v817_v48, 0.0  ;;  %v893_v26 = vsel %vm2368_vm2, %v1992_v18, 0.0  ;;  %v878_v12 = vsel %vm2370_vm15, %v1992_v18, 0.0  ;;  %vm2371_vm15 = vcmp.eq.s32.totalorder %v1656_v60, 3 }
 0x1db   :  { %865 = vadd.xlane.f32.xlu0 %v864_v11  ;;  %1104 = vmatpush.msra.mxu2 %v1039_v29  ;;  %v897_v14 = vsel %vm205_vm7, %v893_v26, 0.0  ;;  %v882_v22 = vsel %vm205_vm7, %v878_v12, 0.0  ;;  %v938_v11 = vsel %vm60_vm6, %v1992_v18, 0.0  ;;  %v923_v61 = vsel %vm2371_vm15, %v1992_v18, 0.0 }
 0x1dd   :  { %v575_v23 = vpop.xlane.xlu2 %574 }
 0x1de   :  { %v579_v37 = vperm.slane %v575_v23, %v1877_v44  ;;  %v544_v28 = vpop.xlane.xlu1 %543  ;;  %v560_v31 = vpop.xlane.xlu0 %559  ;;  %v908_v23 = vsel %vm56_vm5, %v1992_v18, 0.0 }
 0x1df   :  { %v2012_v40 = vpop.eup %1417  ;;  %v548_v36 = vperm.slane %v544_v28, %v1877_v44  ;;  %v564_v30 = vperm.slane %v560_v31, %v1877_v44  ;;  %v1076_v39 = vpop.f32.mrf.mxu1 }
 0x1e0   :  { %v580_v41 = vsel %vm217_vm1, %v579_v37, %v578_v25  ;;  %1386 = vmatmul.msk.f32.vlgmr.msra.gmra.mxu2 %vm205_vm7, %v2012_v40  ;;  %v1080_v43 = vsel %vm2365_vm0, %v1076_v39, 0.0  ;;  %vm2367_vm0 = vcmp.eq.s32.totalorder %v1656_v60, 4294967293  ;;  %v912_v25 = vsel %vm205_vm7, %v908_v23, 0.0 }
 0x1e1   :  { %1331 = vst.msk [vmem:[%s2344_s7 + $0x12] sm:$0x1] %vm220_vm3, %v580_v41  ;;  %v549_v45 = vsel %vm217_vm1, %v548_v36, %v547_v35  ;;  %v565_v46 = vsel %vm217_vm1, %v564_v30, %v563_v24  ;;  %1419 = vtanh.f32 %v1080_v43  ;;  %v833_v50 = vsel %vm2367_vm0, %v1992_v18, 0.0 }
 0x1e2   :  { %1329 = vst.msk [vmem:[%s2344_s7 + $0x10] sm:$0x1] %vm220_vm3, %v549_v45  ;;  %925 = vadd.xlane.f32.xlu2 %v924_v42  ;;  %940 = vadd.xlane.f32.xlu1 %v939_v13  ;;  %v837_v16 = vsel %vm205_vm7, %v833_v50, 0.0  ;;  %vm2369_vm0 = vcmp.eq.s32.totalorder %v1656_v60, 4294967295  ;;  %v942_v24 = vsel %vm205_vm7, %v938_v11, 0.0  ;;  %v927_v37 = vsel %vm205_vm7, %v923_v61, 0.0 }
 0x1e3   :  { %1330 = vst.msk [vmem:[%s2344_s7 + $0x11] sm:$0x1] %vm220_vm3, %v565_v46  ;;  %910 = vadd.xlane.f32.xlu0 %v909_v1  ;;  %v863_v15 = vsel %vm2369_vm0, %v1992_v18, 0.0  ;;  %v1157_v28 = vsel %vm45_vm9, %v2012_v40, 0.0  ;;  %v1172_v31 = vsel %vm47_vm8, %v2012_v40, 0.0  ;;  %v1141_v18 = vsel %vm43_vm10, %v2012_v40, 0.0  ;;  %vm2374_vm9 = vmmov %vm2369_vm0 }
 0x1e4   :  { %v867_v34 = vsel %vm205_vm7, %v863_v15, 0.0  ;;  %v1159_v32 = vsel %vm205_vm7, %v1157_v28, 0.0  ;;  %v1174_v35 = vsel %vm205_vm7, %v1172_v31, 0.0  ;;  %v1143_v36 = vsel %vm205_vm7, %v1141_v18, 0.0 }
 0x1e5   :  { %v620_v49 = vpop.xlane.xlu2 %619  ;;  %v1202_v30 = vsel %vm51_vm11, %v2012_v40, 0.0  ;;  %v1217_v38 = vsel %vm53_vm12, %v2012_v40, 0.0  ;;  %v1187_v39 = vsel %vm49_vm13, %v2012_v40, 0.0  ;;  %v1247_v46 = vsel %vm57_vm14, %v2012_v40, 0.0  ;;  %vm2376_vm11 = vmmov %vm2368_vm2 }
 0x1e6   :  { %v624_v56 = vperm.slane %v620_v49, %v1877_v44  ;;  %v590_v57 = vpop.xlane.xlu1 %589  ;;  %v605_v58 = vpop.xlane.xlu0 %604  ;;  %v1204_v41 = vsel %vm205_vm7, %v1202_v30, 0.0  ;;  %v1219_v42 = vsel %vm205_vm7, %v1217_v38, 0.0  ;;  %v1189_v43 = vsel %vm205_vm7, %v1187_v39, 0.0  ;;  %vm2379_vm14 = vmmov %vm2371_vm15 }
 0x1e7   :  { %v2058_v62 = vpop.eup %1419  ;;  %v594_v0 = vperm.slane %v590_v57, %v1877_v44  ;;  %v609_v2 = vperm.slane %v605_v58, %v1877_v44  ;;  %vm2372_vm8 = vcmp.eq.s32.totalorder %v1651_v54, 2  ;;  %v1249_v47 = vsel %vm205_vm7, %v1247_v46, 0.0 }
 0x1e8   :  { %v625_v19 = vsel %vm217_vm1, %v624_v56, %v623_v53  ;;  %1387 = vmatmul.msk.f32.gmra.mxu2 %vm205_vm7, %v2058_v62  ;;  %v1142_v45 = vsel %vm44_vm4, %v2058_v62, 0.0  ;;  %v1232_v1 = vsel %vm2372_vm8, %v2012_v40, 0.0  ;;  %vm2373_vm4 = vcmp.eq.s32.totalorder %v1656_v60, 4294967294 }
 0x1e9   :  { %1334 = vst.msk [vmem:[%s2344_s7 + $0x15] sm:$0x1] %vm220_vm3, %v625_v19  ;;  %v595_v63 = vsel %vm217_vm1, %v594_v0, %v593_v55  ;;  %v610_v20 = vsel %vm217_vm1, %v609_v2, %v608_v51  ;;  %v1146_v13 = vsel %vm205_vm7, %v1142_v45, 0.0  ;;  %v1234_v48 = vsel %vm205_vm7, %v1232_v1, 0.0 }
 0x1ea   :  { %1332 = vst.msk [vmem:[%s2344_s7 + $0x13] sm:$0x1] %vm220_vm3, %v595_v63  ;;  %853 = vadd.xlane.f32.xlu2 %v852_v3  ;;  %822 = vadd.xlane.f32.xlu1 %v821_v59  ;;  %v1173_v49 = vsel %vm2373_vm4, %v2058_v62, 0.0  ;;  %v1188_v50 = vsel %vm2374_vm9, %v2058_v62, 0.0  ;;  %vm2375_vm10 = vcmp.eq.s32.totalorder %v1656_v60, 4294967293  ;;  %v1218_v57 = vsel %vm2376_vm11, %v2058_v62, 0.0 }
 0x1eb   :  { %1333 = vst.msk [vmem:[%s2344_s7 + $0x14] sm:$0x1] %vm220_vm3, %v610_v20  ;;  %838 = vadd.xlane.f32.xlu0 %v837_v16  ;;  %v1158_v51 = vsel %vm2375_vm10, %v2058_v62, 0.0  ;;  %v1177_v53 = vsel %vm205_vm7, %v1173_v49, 0.0  ;;  %v1192_v55 = vsel %vm205_vm7, %v1188_v50, 0.0  ;;  %v1233_v58 = vsel %vm56_vm5, %v2058_v62, 0.0 }
 0x1ec   :  { %v1162_v56 = vsel %vm205_vm7, %v1158_v51, 0.0  ;;  %vm2377_vm12 = vcmp.eq.s32.totalorder %v1656_v60, 0  ;;  %v1222_v2 = vsel %vm205_vm7, %v1218_v57, 0.0  ;;  %v1237_v3 = vsel %vm205_vm7, %v1233_v58, 0.0 }
 0x1ed   :  { %v665_v5 = vpop.xlane.xlu2 %664  ;;  %v1203_v0 = vsel %vm2377_vm12, %v2058_v62, 0.0  ;;  %v1263_v19 = vsel %vm60_vm6, %v2058_v62, 0.0  ;;  %vm2378_vm13 = vcmp.eq.s32.totalorder %v1651_v54, 4  ;;  %v1248_v63 = vsel %vm2379_vm14, %v2058_v62, 0.0 }
 0x1ee   :  { %v669_v7 = vperm.slane %v665_v5, %v1877_v44  ;;  %v635_v8 = vpop.xlane.xlu1 %634  ;;  %v650_v10 = vpop.xlane.xlu0 %649  ;;  %v1207_v59 = vsel %vm205_vm7, %v1203_v0, 0.0  ;;  %v1262_v16 = vsel %vm2378_vm13, %v2012_v40, 0.0  ;;  %v1267_v20 = vsel %vm205_vm7, %v1263_v19, 0.0 }
 0x1ef   :  { %v639_v9 = vperm.slane %v635_v8, %v1877_v44  ;;  %v654_v29 = vperm.slane %v650_v10, %v1877_v44  ;;  %v1252_v5 = vsel %vm205_vm7, %v1248_v63, 0.0  ;;  %vm2380_vm6 = vcmask 31744  }
 0x1f0   :  { %v670_v27 = vsel %vm217_vm1, %v669_v7, %v668_v6 }
 0x1f1   :  { %1337 = vst.msk [vmem:[%s2344_s7 + $0x18] sm:$0x1] %vm220_vm3, %v670_v27  ;;  %v640_v33 = vsel %vm217_vm1, %v639_v9, %v638_v17  ;;  %v655_v21 = vsel %vm217_vm1, %v654_v29, %v653_v4  ;;  %v1264_v4 = vsel %vm205_vm7, %v1262_v16, 0.0  ;;  %vm2381_vm7 = vmmov %vm2380_vm6 }
 0x1f2   :  { %1335 = vst.msk [vmem:[%s2344_s7 + $0x16] sm:$0x1] %vm220_vm3, %v640_v33  ;;  %898 = vadd.xlane.f32.xlu2 %v897_v14  ;;  %868 = vadd.xlane.f32.xlu1 %v867_v34 }
 0x1f3   :  { %1336 = vst.msk [vmem:[%s2344_s7 + $0x17] sm:$0x1] %vm220_vm3, %v655_v21  ;;  %883 = vadd.xlane.f32.xlu0 %v882_v22 }
 0x1fa   :  { %943 = vadd.xlane.f32.xlu2 %v942_v24  ;;  %913 = vadd.xlane.f32.xlu1 %v912_v25 }
 0x1fb   :  { %928 = vadd.xlane.f32.xlu0 %v927_v37 }
 0x202   :  { %1160 = vadd.xlane.f32.xlu2 %v1159_v32  ;;  %1175 = vadd.xlane.f32.xlu1 %v1174_v35 }
 0x203   :  { %1144 = vadd.xlane.f32.xlu0 %v1143_v36 }
 0x20a   :  { %1205 = vadd.xlane.f32.xlu2 %v1204_v41  ;;  %1220 = vadd.xlane.f32.xlu1 %v1219_v42 }
 0x20b   :  { %1190 = vadd.xlane.f32.xlu0 %v1189_v43 }
 0x212   :  { %1250 = vadd.xlane.f32.xlu2 %v1249_v47  ;;  %1147 = vadd.xlane.f32.xlu1 %v1146_v13 }
 0x213   :  { %1235 = vadd.xlane.f32.xlu0 %v1234_v48 }
 0x21a   :  { %1178 = vadd.xlane.f32.xlu2 %v1177_v53  ;;  %1193 = vadd.xlane.f32.xlu1 %v1192_v55 }
 0x21b   :  { %1163 = vadd.xlane.f32.xlu0 %v1162_v56 }
 0x222   :  { %1223 = vadd.xlane.f32.xlu2 %v1222_v2  ;;  %1238 = vadd.xlane.f32.xlu1 %v1237_v3 }
 0x223   :  { %1208 = vadd.xlane.f32.xlu0 %v1207_v59 }
 0x22a   :  { %1268 = vadd.xlane.f32.xlu2 %v1267_v20  ;;  %1265 = vadd.xlane.f32.xlu1 %v1264_v4 }
 0x22b   :  { %1253 = vadd.xlane.f32.xlu0 %v1252_v5 }
 0x245   :  { %v836_v6 = vpop.xlane.xlu2 %835  ;;  %v851_v7 = vpop.xlane.xlu1 %850 }
 0x246   :  { %v820_v8 = vpop.xlane.xlu0 %819  ;;  %v857_v9 = vperm.slane %v851_v7, %v1645_v52  ;;  %v842_v21 = vperm.slane %v836_v6, %v1645_v52 }
 0x247   :  { %v826_v29 = vperm.slane %v820_v8, %v1645_v52 }
 0x24d   :  { %v881_v10 = vpop.xlane.xlu2 %880  ;;  %v896_v26 = vpop.xlane.xlu1 %895 }
 0x24e   :  { %v866_v54 = vpop.xlane.xlu0 %865  ;;  %v902_v28 = vperm.slane %v896_v26, %v1645_v52  ;;  %v887_v36 = vperm.slane %v881_v10, %v1645_v52 }
 0x24f   :  { %v872_v31 = vperm.slane %v866_v54, %v1645_v52 }
 0x253   :  { %v1135_v11 = vpop.f32.mrf.mxu3 }
 0x255   :  { %v926_v40 = vpop.xlane.xlu2 %925  ;;  %v941_v15 = vpop.xlane.xlu1 %940 }
 0x256   :  { %v911_v17 = vpop.xlane.xlu0 %910  ;;  %v947_v1 = vperm.slane %v941_v15, %v1645_v52  ;;  %v932_v51 = vperm.slane %v926_v40, %v1645_v52 }
 0x257   :  { %v917_v47 = vperm.slane %v911_v17, %v1645_v52 }
 0x25b   :  { %v1138_v42 = vpop.f32.mrf.mxu3 }
 0x25d   :  { %v854_v60 = vpop.xlane.xlu2 %853  ;;  %v823_v62 = vpop.xlane.xlu1 %822 }
 0x25e   :  { %v858_v12 = vperm.slane %v854_v60, %v1877_v44  ;;  %v827_v27 = vperm.slane %v823_v62, %v1877_v44  ;;  %v839_v33 = vpop.xlane.xlu0 %838 }
 0x25f   :  { %v843_v14 = vperm.slane %v839_v33, %v1877_v44 }
 0x260   :  { %v859_v34 = vsel %vm217_vm1, %v858_v12, %v857_v9  ;;  %v828_v22 = vsel %vm217_vm1, %v827_v27, %v826_v29 }
 0x261   :  { %1355 = vst.msk [vmem:[%s2344_s7 + $0x22] sm:$0x1] %vm220_vm3, %v859_v34  ;;  %v844_v23 = vsel %vm217_vm1, %v843_v14, %v842_v21 }
 0x262   :  { %1353 = vst.msk [vmem:[%s2344_s7 + $0x20] sm:$0x1] %vm220_vm3, %v828_v22 }
 0x263   :  { %1354 = vst.msk [vmem:[%s2344_s7 + $0x21] sm:$0x1] %vm220_vm3, %v844_v23  ;;  %v1106_v61 = vpop.f32.mrf.mxu2 }
 0x264   :  { %v1136_v24 = vadd.f32 %v1135_v11, %v1106_v61 }
 0x265   :  { %v899_v25 = vpop.xlane.xlu2 %898  ;;  %v869_v37 = vpop.xlane.xlu1 %868 }
 0x266   :  { %1399 = vst.msk [vmem:[%s2343_s8 + $0x10] sm:$0xff] %vm2380_vm6, %v1136_v24  ;;  %v903_v18 = vperm.slane %v899_v25, %v1877_v44  ;;  %v873_v32 = vperm.slane %v869_v37, %v1877_v44  ;;  %v884_v35 = vpop.xlane.xlu0 %883 }
 0x267   :  { %v888_v30 = vperm.slane %v884_v35, %v1877_v44 }
 0x268   :  { %v904_v38 = vsel %vm217_vm1, %v903_v18, %v902_v28  ;;  %v874_v39 = vsel %vm217_vm1, %v873_v32, %v872_v31 }
 0x269   :  { %1358 = vst.msk [vmem:[%s2344_s7 + $0x25] sm:$0x1] %vm220_vm3, %v904_v38  ;;  %v889_v41 = vsel %vm217_vm1, %v888_v30, %v887_v36 }
 0x26a   :  { %1356 = vst.msk [vmem:[%s2344_s7 + $0x23] sm:$0x1] %vm220_vm3, %v874_v39 }
 0x26b   :  { %1357 = vst.msk [vmem:[%s2344_s7 + $0x24] sm:$0x1] %vm220_vm3, %v889_v41  ;;  %v1109_v43 = vpop.f32.mrf.mxu2 }
 0x26c   :  { %v1139_v45 = vadd.f32 %v1138_v42, %v1109_v43 }
 0x26d   :  { %v944_v46 = vpop.xlane.xlu2 %943  ;;  %v914_v13 = vpop.xlane.xlu1 %913 }
 0x26e   :  { %v948_v48 = vperm.slane %v944_v46, %v1877_v44  ;;  %v918_v49 = vperm.slane %v914_v13, %v1877_v44  ;;  %v929_v50 = vpop.xlane.xlu0 %928  ;;  %1400 = vst.msk [vmem:[%s2343_s8 + $0x18] sm:$0xff] %vm2381_vm7, %v1139_v45 }
 0x26f   :  { %v933_v53 = vperm.slane %v929_v50, %v1877_v44 }
 0x270   :  { %v949_v55 = vsel %vm217_vm1, %v948_v48, %v947_v1  ;;  %v919_v56 = vsel %vm217_vm1, %v918_v49, %v917_v47 }
 0x271   :  { %1361 = vst.msk [vmem:[%s2344_s7 + $0x28] sm:$0x1] %vm220_vm3, %v949_v55  ;;  %v934_v57 = vsel %vm217_vm1, %v933_v53, %v932_v51 }
 0x272   :  { %1359 = vst.msk [vmem:[%s2344_s7 + $0x26] sm:$0x1] %vm220_vm3, %v919_v56 }
 0x273   :  { %1360 = vst.msk [vmem:[%s2344_s7 + $0x27] sm:$0x1] %vm220_vm3, %v934_v57 }
 0x275   :  { %v1161_v58 = vpop.xlane.xlu2 %1160  ;;  %v1176_v0 = vpop.xlane.xlu1 %1175 }
 0x276   :  { %v1145_v2 = vpop.xlane.xlu0 %1144  ;;  %v1182_v10 = vperm.slane %v1176_v0, %v1645_v52  ;;  %v1167_v17 = vperm.slane %v1161_v58, %v1645_v52 }
 0x277   :  { %v1151_v20 = vperm.slane %v1145_v2, %v1645_v52 }
 0x27d   :  { %v1206_v3 = vpop.xlane.xlu2 %1205  ;;  %v1221_v59 = vpop.xlane.xlu1 %1220 }
 0x27e   :  { %v1191_v19 = vpop.xlane.xlu0 %1190  ;;  %v1227_v33 = vperm.slane %v1221_v59, %v1645_v52  ;;  %v1212_v11 = vperm.slane %v1206_v3, %v1645_v52 }
 0x27f   :  { %v1197_v26 = vperm.slane %v1191_v19, %v1645_v52 }
 0x285   :  { %v1251_v16 = vpop.xlane.xlu2 %1250  ;;  %v1148_v63 = vpop.xlane.xlu1 %1147 }
 0x286   :  { %v1152_v4 = vperm.slane %v1148_v63, %v1877_v44  ;;  %v1236_v5 = vpop.xlane.xlu0 %1235  ;;  %v1257_v35 = vperm.slane %v1251_v16, %v1645_v52 }
 0x287   :  { %v1242_v21 = vperm.slane %v1236_v5, %v1645_v52 }
 0x288   :  { %v1153_v6 = vsel %vm217_vm1, %v1152_v4, %v1151_v20 }
 0x289   :  { %1390 = vst.msk [vmem:[%s2344_s7 + $0x30] sm:$0x1] %vm220_vm3, %v1153_v6 }
 0x28d   :  { %v1179_v7 = vpop.xlane.xlu2 %1178  ;;  %v1194_v8 = vpop.xlane.xlu1 %1193 }
 0x28e   :  { %v1183_v54 = vperm.slane %v1179_v7, %v1877_v44  ;;  %v1198_v40 = vperm.slane %v1194_v8, %v1877_v44  ;;  %v1164_v15 = vpop.xlane.xlu0 %1163 }
 0x28f   :  { %v1168_v60 = vperm.slane %v1164_v15, %v1877_v44 }
 0x290   :  { %v1184_v62 = vsel %vm217_vm1, %v1183_v54, %v1182_v10  ;;  %v1199_v9 = vsel %vm217_vm1, %v1198_v40, %v1197_v26 }
 0x291   :  { %1392 = vst.msk [vmem:[%s2344_s7 + $0x32] sm:$0x1] %vm220_vm3, %v1184_v62  ;;  %v1169_v29 = vsel %vm217_vm1, %v1168_v60, %v1167_v17 }
 0x292   :  { %1393 = vst.msk [vmem:[%s2344_s7 + $0x33] sm:$0x1] %vm220_vm3, %v1199_v9 }
 0x293   :  { %1391 = vst.msk [vmem:[%s2344_s7 + $0x31] sm:$0x1] %vm220_vm3, %v1169_v29 }
 0x295   :  { %v1224_v12 = vpop.xlane.xlu2 %1223  ;;  %v1239_v27 = vpop.xlane.xlu1 %1238 }
 0x296   :  { %v1228_v14 = vperm.slane %v1224_v12, %v1877_v44  ;;  %v1243_v34 = vperm.slane %v1239_v27, %v1877_v44  ;;  %v1209_v22 = vpop.xlane.xlu0 %1208 }
 0x297   :  { %v1213_v23 = vperm.slane %v1209_v22, %v1877_v44 }
 0x298   :  { %v1229_v61 = vsel %vm217_vm1, %v1228_v14, %v1227_v33  ;;  %v1244_v24 = vsel %vm217_vm1, %v1243_v34, %v1242_v21 }
 0x299   :  { %1395 = vst.msk [vmem:[%s2344_s7 + $0x35] sm:$0x1] %vm220_vm3, %v1229_v61  ;;  %v1214_v25 = vsel %vm217_vm1, %v1213_v23, %v1212_v11 }
 0x29a   :  { %1396 = vst.msk [vmem:[%s2344_s7 + $0x36] sm:$0x1] %vm220_vm3, %v1244_v24 }
 0x29b   :  { %1394 = vst.msk [vmem:[%s2344_s7 + $0x34] sm:$0x1] %vm220_vm3, %v1214_v25 }
 0x29d   :  { %v1269_v37 = vpop.xlane.xlu2 %1268  ;;  %v1266_v28 = vpop.xlane.xlu1 %1265 }
 0x29e   :  { %v1273_v31 = vperm.slane %v1269_v37, %v1877_v44  ;;  %v1272_v18 = vperm.slane %v1266_v28, %v1645_v52  ;;  %v1254_v32 = vpop.xlane.xlu0 %1253 }
 0x29f   :  { %v1258_v36 = vperm.slane %v1254_v32, %v1877_v44 }
 0x2a0   :  { %v1274_v30 = vsel %vm217_vm1, %v1273_v31, %v1272_v18 }
 0x2a1   :  { %1398 = vst.msk [vmem:[%s2344_s7 + $0x38] sm:$0x1] %vm220_vm3, %v1274_v30  ;;  %v1259_v38 = vsel %vm217_vm1, %v1258_v36, %v1257_v35 }
 0x2a2   :  { %1397 = vst.msk [vmem:[%s2344_s7 + $0x37] sm:$0x1] %vm220_vm3, %v1259_v38 }

</bundles_post_ra>
